<compile_context>
chip_gen: v7x
topology: tpu7x:2x2x1
jax: 0.10.0
libtpu: 0.0.40
codegen_flags: <defaults>
</compile_context>

<pallas_src>
import numpy as np
import jax
import jax.numpy as jnp
from jax import lax
from jax.experimental import pallas as pl
from jax.experimental.pallas import tpu as pltpu


# ----------------------------------------------------------------------------
# Parameter construction (mirrors init_kernels(..., invers=True) in numpy).
# Deterministic, computed in-script -- no checkpoint loading.
# ----------------------------------------------------------------------------
def _hamming_periodic(n):
    # scipy.signal.get_window('hamming', n, fftbins=True)
    return 0.54 - 0.46 * np.cos(2.0 * np.pi * np.arange(n) / n)


def init_kernels(win_len, win_inc, fft_len, win_type="hamming", invers=False):
    if win_type is None or win_type == "None":
        window = np.ones(win_len)
    elif win_type == "hamming":
        window = _hamming_periodic(win_len)
    else:
        raise ValueError(f"unsupported window {win_type}")
    N = fft_len
    fourier_basis = np.fft.rfft(np.eye(N))[:win_len]           # (win_len, N//2+1) complex
    real_kernel = np.real(fourier_basis)
    imag_kernel = np.imag(fourier_basis)
    kernel = np.concatenate([real_kernel, imag_kernel], 1).T   # (N+2, win_len)
    if invers:
        kernel = np.linalg.pinv(kernel).T                      # (N+2, win_len)
    kernel = kernel * window                                   # broadcast over win_len
    return kernel.astype(np.float32), window.astype(np.float32)


def _round_up(x, m):
    return ((x + m - 1) // m) * m


# ----------------------------------------------------------------------------
# Pallas kernel
# ----------------------------------------------------------------------------
def _make_istft_kernel(T_blk, stride, r, n_chunks, acc_rows, T_true, ragged):
    def kernel(mag_ref, ph_ref, wr_ref, wi_ref, icoff_ref, out_ref, acc_ref):
        # mag_ref/ph_ref : [1, F, T_blk] f32   wr_ref/wi_ref : [F, Kp] bf16
        # icoff_ref/out  : [n_blocks, stride]  acc_ref : [acc_rows, stride] scratch
        i = pl.program_id(1)

        @pl.when(i == 0)
        def _init():
            out_ref[...] = jnp.zeros_like(out_ref)

        mag = mag_ref[0]                                   # [F, T_blk]
        ph = ph_ref[0]
        if ragged:
            # Last chunk extends past T: stale tail columns must not reach the
            # transcendentals / MXU, mask them to zero first (no wrapper jnp.pad).
            col = lax.broadcasted_iota(jnp.int32, mag.shape, 1)
            valid = (i * T_blk + col) < T_true
            mag = jnp.where(valid, mag, 0.0)
            ph = jnp.where(valid, ph, 0.0)

        real = (mag * jnp.cos(ph)).astype(jnp.bfloat16)    # EUP sin/cos in f32,
        imag = (mag * jnp.sin(ph)).astype(jnp.bfloat16)    # bf16 operands for the MXU

        # frames[t, k] = sum_f real[f,t]*Wr[f,k] + imag[f,t]*Wi[f,k]
        # Contract the F axis directly (transposed-LHS folded into the MXU feed):
        # produces [T_blk, Kp] without an explicit transpose of the result.
        dn = (((0,), (0,)), ((), ()))
        frames = lax.dot_general(real, wr_ref[...], dn,
                                 preferred_element_type=jnp.float32)
        frames = frames + lax.dot_general(imag, wi_ref[...], dn,
                                          preferred_element_type=jnp.float32)
        # frames: [T_blk, Kp] f32, Kp = r*stride (zero taps beyond win_len)

        # Overlap-add: r static sublane-offset accumulations into a small scratch,
        # then one 8-aligned windowed add into the resident output accumulator.
        acc_ref[pl.ds(0, T_blk), :] = frames[:, 0:stride]
        if acc_rows > T_blk:
            acc_ref[pl.ds(T_blk, acc_rows - T_blk), :] = jnp.zeros(
                (acc_rows - T_blk, stride), jnp.float32)
        for j in range(1, r):
            acc_ref[pl.ds(j, T_blk), :] += frames[:, j * stride:(j + 1) * stride]

        if T_blk % 8 == 0:
            base = pl.multiple_of(i * T_blk, 8)            # aligned windowed store
        else:
            base = i * T_blk                               # single-chunk case (i == 0)
        out_ref[pl.ds(base, acc_rows), :] += acc_ref[...]

        @pl.when(i == n_chunks - 1)
        def _fin():
            # hoisted window-energy normalisation: multiply by 1/(coff + 1e-8)
            out_ref[...] = out_ref[...] * icoff_ref[...]

    return kernel


def conv_istft(mags, phase, weight, window, win_len, stride, t_block=512):
    """mags, phase: [B, F, T] float32 (same layout as the PyTorch module)."""
    B, F, T = mags.shape
    K = win_len
    assert weight.shape == (2 * F, K)
    assert t_block % 128 == 0

    r = -(-K // stride)                       # overlap factor = ceil(win / hop)
    Kp = r * stride                           # tap-padded frame length

    # ---- time chunking (lane dim of spectra blocks: multiple of 128 or full T) ----
    if T <= t_block:
        T_blk, n_chunks = T, 1
    else:
        T_blk, n_chunks = t_block, -(-T // t_block)
    ragged = (T % T_blk) != 0                 # partial last chunk -> mask in-kernel

    acc_rows = _round_up(T_blk + r - 1, 8)    # per-chunk OA extent (sublane aligned)
    n_blocks = (n_chunks - 1) * T_blk + acc_rows
    L_pad = n_blocks * stride
    L_true = (T - 1) * stride + K

    # ---- host-side constants: tap-padded weights (bf16), hoisted 1/(coff+eps) ----
    w_np = np.asarray(weight, np.float32)
    w_real = np.zeros((F, Kp), np.float32)
    w_imag = np.zeros((F, Kp), np.float32)
    w_real[:, :K] = w_np[:F]                  # [F, Kp]
    w_imag[:, :K] = w_np[F:]
    wsq = np.asarray(window, np.float32) ** 2
    coff = np.zeros(L_pad, np.float32)
    idx = np.arange(T)[:, None] * stride + np.arange(K)[None, :]
    np.add.at(coff, idx.reshape(-1), np.broadcast_to(wsq, (T, K)).reshape(-1).copy())
    icoff = (1.0 / (coff + 1e-8)).reshape(n_blocks, stride).astype(np.float32)

    w_real = jnp.asarray(w_real, jnp.bfloat16)   # MXU operands in bf16 (f32 accumulate)
    w_imag = jnp.asarray(w_imag, jnp.bfloat16)
    icoff = jnp.asarray(icoff)

    grid = (B, n_chunks)
    grid_spec = pltpu.PrefetchScalarGridSpec(
        num_scalar_prefetch=0,
        grid=grid,
        in_specs=[
            pl.BlockSpec((1, F, T_blk), lambda b, i: (b, 0, i)),   # mags chunk
            pl.BlockSpec((1, F, T_blk), lambda b, i: (b, 0, i)),   # phase chunk
            pl.BlockSpec((F, Kp), lambda b, i: (0, 0)),            # Wr (resident)
            pl.BlockSpec((F, Kp), lambda b, i: (0, 0)),            # Wi (resident)
            pl.BlockSpec((n_blocks, stride), lambda b, i: (0, 0)), # 1/coff (resident)
        ],
        out_specs=pl.BlockSpec((n_blocks, stride), lambda b, i: (b, 0)),
        scratch_shapes=[pltpu.VMEM((acc_rows, stride), jnp.float32)],
    )

    # ---- VMEM budget (lane-padded), capped below the physical per-core VMEM ----
    lane, f32, bf16 = 128, 4, 2
    Fp = _round_up(F, 8)
    Kpl = _round_up(Kp, lane)
    spad = _round_up(stride, lane)
    need = (2 * 2 * Fp * T_blk * f32                 # mag+phase double buffers
            + 2 * 2 * Fp * Kpl * bf16                # weights
            + 2 * 2 * n_blocks * spad * f32          # resident out + icoff blocks
            + acc_rows * spad * f32                  # OA scratch
            + 8 * T_blk * max(Kpl, lane) * f32)      # in-kernel temporaries headroom
    try:
        vmem_cap = int(pltpu.get_tpu_info().vmem_capacity_bytes)
    except Exception:
        vmem_cap = 64 << 20                          # conservative (v7x per-core)
    vmem_limit = int(min(max(2 * need + (4 << 20), 32 << 20),
                         (vmem_cap * 3) // 4, 100 << 20))

    cost = pl.CostEstimate(
        flops=int(4 * B * n_chunks * T_blk * Kp * F),          # two matmuls
        transcendentals=int(2 * B * n_chunks * T_blk * F),     # sin + cos
        bytes_accessed=int(f32 * (2 * B * F * T + (B + 1) * n_blocks * stride)
                           + bf16 * 2 * F * Kp),
    )

    out_rows = pl.pallas_call(
        _make_istft_kernel(T_blk, stride, r, n_chunks, acc_rows, T, ragged),
        out_shape=jax.ShapeDtypeStruct((B * n_blocks, stride), jnp.float32),
        grid_spec=grid_spec,
        compiler_params=pltpu.CompilerParams(
            dimension_semantics=("parallel", "arbitrary"),
            vmem_limit_bytes=vmem_limit,
        ),
        cost_estimate=cost,
    )(mags, phase, w_real, w_imag, icoff)

    out_full = out_rows.reshape(B, L_pad)     # contiguous reshape (row b*n_blocks+m)
    trim = K - stride
    return out_full[:, trim:L_true - trim]    # matches [..., win-hop : -(win-hop)]


# ----------------------------------------------------------------------------
# Pure-JAX reference (correctness check only)
# ----------------------------------------------------------------------------
def reference_istft(mags, phase, weight, window, win_len, stride):
    B, F, T = mags.shape
    real = mags * jnp.cos(phase)
    imag = mags * jnp.sin(phase)
    cspec = jnp.concatenate([real, imag], axis=1)                 # [B, 2F, T]
    W = jnp.asarray(weight)                                       # [2F, K]
    frames = jnp.einsum("bct,ck->btk", cspec, W)                  # [B, T, K]
    L = (T - 1) * stride + win_len
    idx = jnp.arange(T)[:, None] * stride + jnp.arange(win_len)[None, :]
    out = jnp.zeros((B, L), jnp.float32).at[:, idx].add(frames)
    wsq = jnp.asarray(window) ** 2
    coff = jnp.zeros((L,), jnp.float32).at[idx].add(jnp.broadcast_to(wsq, (T, win_len)))
    out = out / (coff[None, :] + 1e-8)
    trim = win_len - stride
    return out[:, trim:L - trim]


if __name__ == "__main__":
    # Small but representative sizes.  Two configs: single chunk (T <= 512) and a
    # multi-chunk ragged tail (T=600 -> 2 chunks with in-kernel tail masking).
    win_len, win_inc, fft_len = 16, 8, 16
    F = fft_len // 2 + 1                                          # 9 freq bins

    weight, window = init_kernels(win_len, win_inc, fft_len, "hamming", invers=True)

    key = jax.random.PRNGKey(0)
    for B, T in ((2, 200), (2, 600)):
        key, k1, k2 = jax.random.split(key, 3)
        mags = jax.random.uniform(k1, (B, F, T), jnp.float32)
        phase = jax.random.uniform(k2, (B, F, T), jnp.float32,
                                   minval=-np.pi, maxval=np.pi)

        out = conv_istft(mags, phase, weight, window, win_len, win_inc)
        out = jax.block_until_ready(out)

        ref = reference_istft(mags, phase, weight, window, win_len, win_inc)
        expected_len = (T - 1) * win_inc + win_len - 2 * (win_len - win_inc)
        assert out.shape == ref.shape == (B, expected_len), (out.shape, ref.shape)
        max_err = float(jnp.max(jnp.abs(out - ref)))
        # bf16 MXU operands (f32 accumulation) -> slightly looser tolerance than
        # the all-f32 path; observed error is well below this bound.
        assert max_err < 2e-2, max_err

    print("KERNEL_OK")
</pallas_src>

<mosaic_0001>
module attributes {stable_mosaic.version = 11 : i64} {
  func.func @kernel(%arg0: i32, %arg1: i32, %arg2: memref<1x9x200xf32, #tpu.memory_space<vmem>>, %arg3: memref<1x9x200xf32, #tpu.memory_space<vmem>>, %arg4: memref<9x16xbf16, #tpu.memory_space<vmem>>, %arg5: memref<9x16xbf16, #tpu.memory_space<vmem>>, %arg6: memref<208x8xf32, #tpu.memory_space<vmem>>, %arg7: memref<208x8xf32, #tpu.memory_space<vmem>>, %arg8: memref<208x8xf32, #tpu.memory_space<vmem>>) attributes {dimension_semantics = [#tpu.dimension_semantics<parallel>, #tpu.dimension_semantics<arbitrary>], iteration_bounds = array<i64: 2, 1>, scalar_prefetch = 0 : i64, scratch_operands = 1 : i64, tpu.core_type = #tpu.core_type<tc>, window_params = [{transform_indices = @transform_0, window_bounds = array<i64: 1, 9, 200>}, {transform_indices = @transform_1, window_bounds = array<i64: 1, 9, 200>}, {pipeline_mode = #tpu.pipeline_mode<synchronous>, transform_indices = @transform_2, window_bounds = array<i64: 9, 16>}, {pipeline_mode = #tpu.pipeline_mode<synchronous>, transform_indices = @transform_3, window_bounds = array<i64: 9, 16>}, {pipeline_mode = #tpu.pipeline_mode<synchronous>, transform_indices = @transform_4, window_bounds = array<i64: 208, 8>}, {transform_indices = @transform_5, window_bounds = array<i64: 208, 8>}]} {
    %c0_i32 = arith.constant 0 : i32
    %0 = arith.cmpi eq, %arg1, %c0_i32 : i32
    %1 = arith.extui %0 : i1 to i32
    %c0_i32_0 = arith.constant 0 : i32
    %2 = arith.cmpi ne, %1, %c0_i32_0 : i32
    scf.if %2 {
      %cst_24 = arith.constant 0.000000e+00 : f32
      %37 = vector.broadcast %cst_24 : f32 to vector<208x8xf32>
      %c0_25 = arith.constant 0 : index
      %c0_26 = arith.constant 0 : index
      %38 = vector.load %arg7[%c0_25, %c0_26] : memref<208x8xf32, #tpu.memory_space<vmem>>, vector<208x8xf32>
      tpu.vector_store %arg7[%c0_25, %c0_26], %37 {strides = array<i32>} : memref<208x8xf32, #tpu.memory_space<vmem>>, vector<208x8xf32>,
    } else {
    }
    %c0 = arith.constant 0 : index
    %c0_1 = arith.constant 0 : index
    %c0_2 = arith.constant 0 : index
    %3 = vector.load %arg2[%c0, %c0_1, %c0_2] : memref<1x9x200xf32, #tpu.memory_space<vmem>>, vector<1x9x200xf32>
    %4 = vector.shape_cast %3 : vector<1x9x200xf32> to vector<9x200xf32>
    %c0_3 = arith.constant 0 : index
    %c0_4 = arith.constant 0 : index
    %c0_5 = arith.constant 0 : index
    %5 = vector.load %arg3[%c0_3, %c0_4, %c0_5] : memref<1x9x200xf32, #tpu.memory_space<vmem>>, vector<1x9x200xf32>
    %6 = vector.shape_cast %5 : vector<1x9x200xf32> to vector<9x200xf32>
    %7 = math.cos %6 : vector<9x200xf32>
    %8 = arith.mulf %4, %7 : vector<9x200xf32>
    %9 = arith.truncf %8 : vector<9x200xf32> to vector<9x200xbf16>
    %10 = math.sin %6 : vector<9x200xf32>
    %11 = arith.mulf %4, %10 : vector<9x200xf32>
    %12 = arith.truncf %11 : vector<9x200xf32> to vector<9x200xbf16>
    %c0_6 = arith.constant 0 : index
    %c0_7 = arith.constant 0 : index
    %13 = vector.load %arg4[%c0_6, %c0_7] : memref<9x16xbf16, #tpu.memory_space<vmem>>, vector<9x16xbf16>
    %cst = arith.constant dense<0.000000e+00> : vector<200x16xf32>
    %14 = tpu.matmul %9, %13, %cst {dimension_numbers = #tpu.dot_dimension_numbers<[0], [0], [1], [1], [0, 1, 1, 1], [], []>} : vector<9x200xbf16>, vector<9x16xbf16>, vector<200x16xf32> -> vector<200x16xf32>
    %c0_8 = arith.constant 0 : index
    %c0_9 = arith.constant 0 : index
    %15 = vector.load %arg5[%c0_8, %c0_9] : memref<9x16xbf16, #tpu.memory_space<vmem>>, vector<9x16xbf16>
    %cst_10 = arith.constant dense<0.000000e+00> : vector<200x16xf32>
    %16 = tpu.matmul %12, %15, %cst_10 {dimension_numbers = #tpu.dot_dimension_numbers<[0], [0], [1], [1], [0, 1, 1, 1], [], []>} : vector<9x200xbf16>, vector<9x16xbf16>, vector<200x16xf32> -> vector<200x16xf32>
    %17 = arith.addf %14, %16 : vector<200x16xf32>
    %18 = vector.extract_strided_slice %17 {offsets = [0, 0], sizes = [200, 8], strides = [1, 1]} : vector<200x16xf32> to vector<200x8xf32>
    %c0_11 = arith.constant 0 : index
    %c0_12 = arith.constant 0 : index
    %19 = vector.load %arg8[%c0_11, %c0_12] : memref<208x8xf32, #tpu.memory_space<vmem>>, vector<200x8xf32>
    tpu.vector_store %arg8[%c0_11, %c0_12], %18 {strides = array<i32>} : memref<208x8xf32, #tpu.memory_space<vmem>>, vector<200x8xf32>,
    %cst_13 = arith.constant 0.000000e+00 : f32
    %20 = vector.broadcast %cst_13 : f32 to vector<8x8xf32>
    %c200 = arith.constant 200 : index
    %c0_14 = arith.constant 0 : index
    %21 = vector.load %arg8[%c200, %c0_14] : memref<208x8xf32, #tpu.memory_space<vmem>>, vector<8x8xf32>
    tpu.vector_store %arg8[%c200, %c0_14], %20 {strides = array<i32>} : memref<208x8xf32, #tpu.memory_space<vmem>>, vector<8x8xf32>,
    %c1 = arith.constant 1 : index
    %c0_15 = arith.constant 0 : index
    %22 = vector.load %arg8[%c1, %c0_15] : memref<208x8xf32, #tpu.memory_space<vmem>>, vector<200x8xf32>
    %23 = vector.extract_strided_slice %17 {offsets = [0, 8], sizes = [200, 8], strides = [1, 1]} : vector<200x16xf32> to vector<200x8xf32>
    %24 = arith.addf %22, %23 : vector<200x8xf32>
    %c1_16 = arith.constant 1 : index
    %c0_17 = arith.constant 0 : index
    %25 = vector.load %arg8[%c1_16, %c0_17] : memref<208x8xf32, #tpu.memory_space<vmem>>, vector<200x8xf32>
    tpu.vector_store %arg8[%c1_16, %c0_17], %24 {strides = array<i32>} : memref<208x8xf32, #tpu.memory_space<vmem>>, vector<200x8xf32>,
    %c200_i32 = arith.constant 200 : i32
    %26 = arith.muli %arg1, %c200_i32 : i32
    %27 = tpu.assume_multiple %26, 8 : i32
    %28 = arith.index_cast %27 : i32 to index
    %c0_18 = arith.constant 0 : index
    %29 = vector.load %arg7[%28, %c0_18] : memref<208x8xf32, #tpu.memory_space<vmem>>, vector<208x8xf32>
    %c0_19 = arith.constant 0 : index
    %c0_20 = arith.constant 0 : index
    %30 = vector.load %arg8[%c0_19, %c0_20] : memref<208x8xf32, #tpu.memory_space<vmem>>, vector<208x8xf32>
    %31 = arith.addf %29, %30 : vector<208x8xf32>
    %32 = arith.index_cast %27 : i32 to index
    %c0_21 = arith.constant 0 : index
    %33 = vector.load %arg7[%32, %c0_21] : memref<208x8xf32, #tpu.memory_space<vmem>>, vector<208x8xf32>
    tpu.vector_store %arg7[%32, %c0_21], %31 {strides = array<i32>} : memref<208x8xf32, #tpu.memory_space<vmem>>, vector<208x8xf32>,
    %c0_i32_22 = arith.constant 0 : i32
    %34 = arith.cmpi eq, %arg1, %c0_i32_22 : i32
    %35 = arith.extui %34 : i1 to i32
    %c0_i32_23 = arith.constant 0 : i32
    %36 = arith.cmpi ne, %35, %c0_i32_23 : i32
    scf.if %36 {
      %c0_24 = arith.constant 0 : index
      %c0_25 = arith.constant 0 : index
      %37 = vector.load %arg7[%c0_24, %c0_25] : memref<208x8xf32, #tpu.memory_space<vmem>>, vector<208x8xf32>
      %c0_26 = arith.constant 0 : index
      %c0_27 = arith.constant 0 : index
      %38 = vector.load %arg6[%c0_26, %c0_27] : memref<208x8xf32, #tpu.memory_space<vmem>>, vector<208x8xf32>
      %39 = arith.mulf %37, %38 : vector<208x8xf32>
      %c0_28 = arith.constant 0 : index
      %c0_29 = arith.constant 0 : index
      %40 = vector.load %arg7[%c0_28, %c0_29] : memref<208x8xf32, #tpu.memory_space<vmem>>, vector<208x8xf32>
      tpu.vector_store %arg7[%c0_28, %c0_29], %39 {strides = array<i32>} : memref<208x8xf32, #tpu.memory_space<vmem>>, vector<208x8xf32>,
    } else {
    }
    return
  }
  func.func @transform_0(%arg0: i32, %arg1: i32) -> (i32, i32, i32) {
    %c0_i32 = arith.constant 0 : i32
    %c0_i32_0 = arith.constant 0 : i32
    return %arg0, %c0_i32, %arg1 : i32, i32, i32
  }
  func.func @transform_1(%arg0: i32, %arg1: i32) -> (i32, i32, i32) {
    %c0_i32 = arith.constant 0 : i32
    %c0_i32_0 = arith.constant 0 : i32
    return %arg0, %c0_i32, %arg1 : i32, i32, i32
  }
  func.func @transform_2(%arg0: i32, %arg1: i32) -> (i32, i32) {
    %c0_i32 = arith.constant 0 : i32
    %c0_i32_0 = arith.constant 0 : i32
    %c0_i32_1 = arith.constant 0 : i32
    return %c0_i32, %c0_i32_0 : i32, i32
  }
  func.func @transform_3(%arg0: i32, %arg1: i32) -> (i32, i32) {
    %c0_i32 = arith.constant 0 : i32
    %c0_i32_0 = arith.constant 0 : i32
    %c0_i32_1 = arith.constant 0 : i32
    return %c0_i32, %c0_i32_0 : i32, i32
  }
  func.func @transform_4(%arg0: i32, %arg1: i32) -> (i32, i32) {
    %c0_i32 = arith.constant 0 : i32
    %c0_i32_0 = arith.constant 0 : i32
    %c0_i32_1 = arith.constant 0 : i32
    return %c0_i32, %c0_i32_0 : i32, i32
  }
  func.func @transform_5(%arg0: i32, %arg1: i32) -> (i32, i32) {
    %c0_i32 = arith.constant 0 : i32
    %c0_i32_0 = arith.constant 0 : i32
    return %arg0, %c0_i32 : i32, i32
  }
}

</mosaic_0001>

<bundles_post_ra>
// kernel: tpu_custom_call.1
= control target key start
LH: loop header
LB: loop body
LE: loop exit
PB: predicated region body
PF: predicated region fallthrough
CT: control target
= control target key end

     0   :  { %s2483_s18 = smov 0   ;;  %s2485_s19 = smov 0   ;;  %s3369_s0 = inlined_call_operand.vmem [shape: f32[2,9,200], index: 0, kind: input, shape index: {}]   ;;  %s3370_s1 = inlined_call_operand.vmem [shape: f32[2,9,200], index: 1, kind: input, shape index: {}]   ;;  %s3371_s2 = inlined_call_operand.vmem [shape: bf16[9,16], index: 2, kind: input, shape index: {}]   ;;  %s3372_s3 = inlined_call_operand.vmem [shape: bf16[9,16], index: 3, kind: input, shape index: {}]   ;;  %s3373_s4 = inlined_call_operand.vmem [shape: f32[208,8], index: 4, kind: input, shape index: {}]   ;;  %s3374_s5 = inlined_call_operand.vmem [shape: f32[416,8], index: 5, kind: output, shape index: {}]  }
   0x1   :  { %s2487_s20 = smov 0  }
   0x2 LB: > { %s27_s21 = sadd.s32 1, %s2437_s19  ;;  %p2119_p0 = scmp.ge.s32.totalorder %s2441_s20, 1  ;;  %s2441_s20 = sphi %s2487_s20, %s15_s20   ;;  %s2437_s19 = sphi %s2485_s19, %s3382_s19   ;;  %s2433_s18 = sphi %s2483_s18, %s3381_s18  }
   0x3   : > { %p29_p1 = scmp.ge.s32.totalorder %s27_s21, 2  ;;  %p223_p2 = scmp.lt.s32.totalorder %s2441_s20, 3 }
   0x5   : > { %s3384_s21 = smov (%p29_p1, %s27_s21), 0  ;;  %p224_p3 = pnand %p2119_p0, %p223_p2 }
   0x6   : > { %p265_p4 = scmp.lt.s32.totalorder (!%p224_p3), %s2433_s18, 1  ;;  %v2443_v30 = vmov (!%p224_p3), 683565275   ;;  %v2444_v32 = vmov (!%p224_p3), 2475754826   ;;  %s284_s9 = smul.u32 (!%p224_p3), 26, %s2433_s18 }
   0x7   : > { %227 = sbr.rel (%p224_p3) target bundleno = 695 (0x2b7), region = 40  ;;  %v2445_v34 = vmov (!%p224_p3), 2131351028   ;;  %v2446_v36 = vmov (!%p224_p3), 2102212464   ;;  %s2452_s14 = smov (!%p224_p3), 120  }
   0x8   : > { %v2447_v38 = vmov (!%p224_p3), 920167782   ;;  %v2448_v46 = vmov (!%p224_p3), 1326507024   ;;  %p285_p5 = scmp.lt.s32.totalorder (!%p224_p3), %s284_s9, 51 }
   0xe   : > { %s2505_s22 = scalar_select %p265_p4, %s2433_s18, 1 }
   0xf   : > { %s3386_s9 = smov (!%p285_p5, %s284_s9), 51 }
  0x10   : > { %s2187_s23 = sshll.u32 %s2505_s22, 5  ;;  %s2124_s10 = sshll.u32 %s3386_s9, 3 }
  0x11   : > { %s2513_s26 = scalar_lea.vmem %s3370_s1, %s2187_s23  ;;  %s2779_s29 = scalar_lea.vmem %s3369_s0, %s2187_s23 }
  0x12   : > { %v2516_v0 = vld [vmem:[%s2513_s26] sm:$0xff]  ;;  %v2519_v1 = vld [vmem:[%s2513_s26 + $0x10] sm:$0x1]  ;;  %v2526_v6 = vld [vmem:[%s2513_s26 + $0x8] sm:$0xff]  ;;  %s2971_s13 = scalar_lea.vmem %s3374_s5, %s2124_s10 }
  0x13   : > { %v330_v2 = vand.u32 2147483647, %v2516_v0  ;;  %v333_v3 = vand.u32 2139095040, %v2516_v0  ;;  %v536_v4 = vand.u32 2147483647, %v2519_v1  ;;  %v539_v5 = vand.u32 2139095040, %v2519_v1 }
  0x14   : > { %v436_v11 = vand.u32 2139095040, %v2526_v6  ;;  %v433_v24 = vand.u32 2147483647, %v2526_v6  ;;  %vm332_vm13 = vcmp.lt.s32.totalorder %v2516_v0, 0 }
  0x15   : > { %v334_v7 = vshrl.u32 %v333_v3, 23  ;;  %v337_v8 = vand.u32 8388607, %v330_v2  ;;  %v540_v9 = vshrl.u32 %v539_v5, 23  ;;  %v543_v10 = vand.u32 8388607, %v536_v4 }
  0x16   : > { %v437_v14 = vshrl.u32 %v436_v11, 23  ;;  %vm2639_vm14 = vcmp.le.f32.partialorder %v330_v2, 0.7853982 }
  0x17   : > { %v2125_v12 = vadd.s32 4294967169, %v334_v7  ;;  %v2133_v13 = vadd.s32 4294967169, %v540_v9  ;;  %v338_v16 = vor.u32 8388608, %v337_v8  ;;  %v544_v17 = vor.u32 8388608, %v543_v10 }
  0x18   : > { %v2129_v19 = vadd.s32 4294967169, %v437_v14 }
  0x19   : > { %v340_v15 = vadd.s32 1, %v2125_v12  ;;  %v546_v18 = vadd.s32 1, %v2133_v13  ;;  %v2534_v25 = vshll.u32 %v338_v16, 8  ;;  %v2536_v27 = vshll.u32 %v544_v17, 8 }
  0x1a   : > { %v2538_v28 = vadd.s32 1, %v2129_v19 }
  0x1b   : > { %vm341_vm0 = vcmp.gt.s32.totalorder %v340_v15, 0  ;;  %vm547_vm1 = vcmp.gt.s32.totalorder %v546_v18, 0 }
  0x1c   : > { %v342_v20 = vsel %vm341_vm0, %v340_v15, 0  ;;  %v548_v23 = vsel %vm547_vm1, %v546_v18, 0  ;;  %vm444_vm6 = vcmp.gt.s32.totalorder %v2538_v28, 0  ;;  %vm538_vm0 = vcmp.lt.s32.totalorder %v2519_v1, 0 }
  0x1d   : > { %v343_v21 = vshrl.u32 %v342_v20, 5  ;;  %v344_v22 = vand.u32 31, %v342_v20  ;;  %v550_v26 = vand.u32 31, %v548_v23  ;;  %v2545_v40 = vshrl.u32 %v548_v23, 5 }
  0x1f   : > { %v345_v29 = vsub.s32 32, %v344_v22  ;;  %v347_v31 = vshll.u32 %v2443_v30, %v344_v22  ;;  %v350_v33 = vshll.u32 %v2444_v32, %v344_v22  ;;  %v353_v35 = vshll.u32 %v2445_v34, %v344_v22 }
  0x20   : > { %v356_v37 = vshll.u32 %v2446_v36, %v344_v22  ;;  %v359_v39 = vshll.u32 %v2447_v38, %v344_v22  ;;  %vm362_vm2 = vcmp.lt.s32.totalorder %v343_v21, 1  ;;  %vm363_vm3 = vcmp.lt.s32.totalorder %v343_v21, 2 }
  0x21   : > { %v346_v41 = vshrl.u32 %v2443_v30, %v345_v29  ;;  %v348_v42 = vshrl.u32 %v2444_v32, %v345_v29  ;;  %v351_v43 = vshrl.u32 %v2445_v34, %v345_v29  ;;  %v354_v44 = vshrl.u32 %v2446_v36, %v345_v29 }
  0x22   : > { %v357_v45 = vshrl.u32 %v2447_v38, %v345_v29  ;;  %v360_v47 = vshrl.u32 %v2448_v46, %v345_v29  ;;  %vm365_vm4 = vcmp.lt.s32.totalorder %v343_v21, 4  ;;  %v551_v51 = vsub.s32 32, %v550_v26 }
  0x23   : > { %v349_v48 = vor.u32 %v348_v42, %v347_v31  ;;  %v352_v49 = vor.u32 %v351_v43, %v350_v33  ;;  %v355_v50 = vor.u32 %v354_v44, %v353_v35  ;;  %vm364_vm5 = vcmp.lt.s32.totalorder %v343_v21, 3 }
  0x24   : > { %v358_v52 = vor.u32 %v357_v45, %v356_v37  ;;  %v361_v53 = vor.u32 %v360_v47, %v359_v39  ;;  %v553_v54 = vshll.u32 %v2443_v30, %v550_v26  ;;  %v556_v62 = vshll.u32 %v2444_v32, %v550_v26 }
  0x25   : > { %v366_v55 = vsel %vm362_vm2, %v346_v41, %v349_v48  ;;  %v367_v56 = vsel %vm365_vm4, %v355_v50, 2102212464  ;;  %v370_v57 = vsel %vm362_vm2, %v349_v48, %v352_v49  ;;  %v374_v58 = vsel %vm362_vm2, %v352_v49, %v355_v50 }
  0x26   : > { %v368_v59 = vsel %vm364_vm5, %v352_v49, %v367_v56  ;;  %v371_v60 = vsel %vm365_vm4, %v358_v52, 920167782  ;;  %v375_v61 = vsel %vm365_vm4, %v361_v53, 1326507024  ;;  %v552_v5 = vshrl.u32 %v2443_v30, %v551_v51 }
  0x27   : > { %v372_v63 = vsel %vm364_vm5, %v355_v50, %v371_v60  ;;  %v376_v3 = vsel %vm364_vm5, %v358_v52, %v375_v61  ;;  %v554_v7 = vshrl.u32 %v2444_v32, %v551_v51  ;;  %v369_v8 = vsel %vm363_vm3, %v366_v55, %v368_v59  ;;  %v2592_v52 = vld [vmem:[%s2513_s26 + $0x18] sm:$0x1] }
  0x28   : > { %v373_v9 = vsel %vm363_vm3, %v370_v57, %v372_v63  ;;  %v377_v10 = vsel %vm363_vm3, %v374_v58, %v376_v3  ;;  %v557_v11 = vshrl.u32 %v2445_v34, %v551_v51  ;;  %v559_v18 = vshll.u32 %v2445_v34, %v550_v26 }
  0x29   : > { %v2566_v12 = vmul.u32.u64.low %v2534_v25, %v377_v10  ;;  %v2567_v13 = vmul.u32.u64.high %v2534_v25, %v377_v10, %v2566_v12  ;;  %v2570_v14 = vmul.u32.u64.low %v2534_v25, %v373_v9  ;;  %v2571_v15 = vmul.u32.u64.high %v2534_v25, %v373_v9, %v2570_v14 }
  0x2a   : > { %v555_v16 = vor.u32 %v554_v7, %v553_v54  ;;  %v558_v17 = vor.u32 %v557_v11, %v556_v62  ;;  %v560_v19 = vshrl.u32 %v2446_v36, %v551_v51  ;;  %v562_v20 = vshll.u32 %v2446_v36, %v550_v26 }
  0x2b   : > { %v563_v21 = vshrl.u32 %v2447_v38, %v551_v51  ;;  %v565_v22 = vshll.u32 %v2447_v38, %v550_v26  ;;  %v566_v23 = vshrl.u32 %v2448_v46, %v551_v51  ;;  %v385_v29 = vmul.u32 %v2534_v25, %v369_v8 }
  0x2c   : > { %v561_v31 = vor.u32 %v560_v19, %v559_v18  ;;  %vm568_vm7 = vcmp.lt.s32.totalorder %v2545_v40, 1  ;;  %vm569_vm8 = vcmp.lt.s32.totalorder %v2545_v40, 2  ;;  %vm387_vm9 = vc.u32 %v2567_v13, %v2570_v14 }
  0x2d   : > { %v388_v33 = vadd.s32 1, %v2571_v15  ;;  %v564_v35 = vor.u32 %v563_v21, %v562_v20  ;;  %vm570_vm10 = vcmp.lt.s32.totalorder %v2545_v40, 3  ;;  %v567_v37 = vor.u32 %v566_v23, %v565_v22 }
  0x2e   : > { %vm571_vm11 = vcmp.lt.s32.totalorder %v2545_v40, 4  ;;  %v572_v26 = vsel %vm568_vm7, %v552_v5, %v555_v16  ;;  %v576_v39 = vsel %vm568_vm7, %v555_v16, %v558_v17  ;;  %v580_v43 = vsel %vm568_vm7, %v558_v17, %v561_v31 }
  0x2f   : > { %v389_v25 = vsel %vm387_vm9, %v388_v33, %v2571_v15  ;;  %v573_v41 = vsel %vm571_vm11, %v561_v31, 2102212464  ;;  %v577_v42 = vsel %vm571_vm11, %v564_v35, 920167782  ;;  %v581_v48 = vsel %vm571_vm11, %v567_v37, 1326507024 }
  0x30   : > { %v390_v44 = vadd.s32 %v389_v25, %v385_v29  ;;  %v574_v45 = vsel %vm570_vm10, %v558_v17, %v573_v41  ;;  %v578_v47 = vsel %vm570_vm10, %v561_v31, %v577_v42  ;;  %v582_v51 = vsel %vm570_vm10, %v564_v35, %v581_v48 }
  0x31   : > { %v575_v49 = vsel %vm569_vm8, %v572_v26, %v574_v45  ;;  %v579_v50 = vsel %vm569_vm8, %v576_v39, %v578_v47  ;;  %v445_v53 = vsel %vm444_vm6, %v2538_v28, 0  ;;  %v583_v55 = vsel %vm569_vm8, %v580_v43, %v582_v51 }
  0x32   : > { %v391_v54 = vadd.s32 536870912, %v390_v44  ;;  %v2600_v56 = vmul.u32.u64.low %v2536_v27, %v579_v50  ;;  %v2601_v57 = vmul.u32.u64.high %v2536_v27, %v579_v50, %v2600_v56  ;;  %v440_v61 = vand.u32 8388607, %v433_v24 }
  0x33   : > { %v2605_v58 = vmul.u32.u64.low %v2536_v27, %v583_v55  ;;  %v2606_v59 = vmul.u32.u64.high %v2536_v27, %v583_v55, %v2605_v58  ;;  %v642_v62 = vand.u32 2139095040, %v2592_v52  ;;  %v591_v28 = vmul.u32 %v2536_v27, %v575_v49 }
  0x34   : > { %v392_v60 = vshrl.u32 %v391_v54, 30  ;;  %v447_v63 = vand.u32 31, %v445_v53  ;;  %v594_v3 = vadd.s32 1, %v2601_v57  ;;  %v639_v5 = vand.u32 2147483647, %v2592_v52 }
  0x35   : > { %vm593_vm12 = vc.u32 %v2606_v59, %v2600_v56  ;;  %v441_v9 = vor.u32 8388608, %v440_v61  ;;  %v643_v10 = vshrl.u32 %v642_v62, 23  ;;  %v386_v15 = vadd.s32 %v2570_v14, %v2567_v13 }
  0x36   : > { %v393_v40 = vshll.u32 %v392_v60, 30  ;;  %v595_v8 = vsel %vm593_vm12, %v594_v3, %v2601_v57  ;;  %v448_v12 = vsub.s32 32, %v447_v63  ;;  %v2622_v17 = vshrl.u32 %v445_v53, 5 }
  0x37   : > { %v596_v11 = vadd.s32 %v595_v8, %v591_v28  ;;  %v2626_v18 = vand.u32 8388607, %v639_v5  ;;  %v450_v20 = vshll.u32 %v2443_v30, %v447_v63  ;;  %v2630_v21 = vshll.u32 %v441_v9, 8 }
  0x38   : > { %v2616_v7 = vsub.s32 %v390_v44, %v393_v40  ;;  %v2632_v22 = vadd.s32 4294967169, %v643_v10  ;;  %v451_v29 = vshrl.u32 %v2444_v32, %v448_v12  ;;  %v453_v13 = vshll.u32 %v2444_v32, %v447_v63 }
  0x39   : > { %v597_v16 = vadd.s32 536870912, %v596_v11  ;;  %v454_v14 = vshrl.u32 %v2445_v34, %v448_v12  ;;  %v456_v35 = vshll.u32 %v2445_v34, %v447_v63  ;;  %v457_v37 = vshrl.u32 %v2446_v36, %v448_v12 }
  0x3a   : > { %v396_v27 = vsub.s32 0, %v2616_v7  ;;  %v459_v26 = vshll.u32 %v2446_v36, %v447_v63  ;;  %v416_v39 = vsub.s32 4, %v392_v60  ;;  %v460_v41 = vshrl.u32 %v2447_v38, %v448_v12 }
  0x3b   : > { %v598_v23 = vshrl.u32 %v597_v16, 30  ;;  %vm465_vm15 = vcmp.lt.s32.totalorder %v2622_v17, 1  ;;  %vm466_vm1 = vcmp.lt.s32.totalorder %v2622_v17, 2  ;;  %vm467_vm2 = vcmp.lt.s32.totalorder %v2622_v17, 3 }
  0x3c   : > { %v2126_v19 = vmin.u32 %v396_v27, %v2616_v7  ;;  %vm468_vm3 = vcmp.lt.s32.totalorder %v2622_v17, 4  ;;  %v452_v43 = vor.u32 %v451_v29, %v450_v20  ;;  %v462_v44 = vshll.u32 %v2447_v38, %v447_v63 }
  0x3d   : > { %v599_v25 = vshll.u32 %v598_v23, 30  ;;  %v463_v45 = vshrl.u32 %v2448_v46, %v448_v12  ;;  %v455_v47 = vor.u32 %v454_v14, %v453_v13  ;;  %v458_v48 = vor.u32 %v457_v37, %v456_v35 }
  0x3e   : > { %v398_v33 = vclz %v2126_v19  ;;  %v461_v49 = vor.u32 %v460_v41, %v459_v26  ;;  %v417_v51 = vsel %vm332_vm13, %v416_v39, %v392_v60  ;;  %v449_v54 = vshrl.u32 %v2443_v30, %v448_v12 }
  0x3f   : > { %v2652_v2 = vsub.s32 %v596_v11, %v599_v25  ;;  %v470_v61 = vsel %vm468_vm3, %v458_v48, 2102212464  ;;  %v592_v62 = vadd.s32 %v2600_v56, %v2606_v59  ;;  %v622_v63 = vsub.s32 4, %v598_v23 }
  0x40   : > { %v2127_v42 = vadd.s32 4294967294, %v398_v33  ;;  %v464_v40 = vor.u32 %v463_v45, %v462_v44  ;;  %v473_v8 = vsel %vm465_vm15, %v452_v43, %v455_v47  ;;  %v474_v9 = vsel %vm468_vm3, %v461_v49, 920167782 }
  0x41   : > { %v602_v53 = vsub.s32 0, %v2652_v2  ;;  %vm2674_vm5 = vcmp.le.f32.partialorder %v536_v4, 0.7853982  ;;  %v469_v59 = vsel %vm465_vm15, %v449_v54, %v452_v43  ;;  %v471_v11 = vsel %vm467_vm2, %v455_v47, %v470_v61 }
  0x42   : > { %vm2128_vm4 = vcmp.lt.s32.totalorder %v2127_v42, 0  ;;  %v477_v16 = vsel %vm465_vm15, %v455_v47, %v458_v48  ;;  %v623_v4 = vsel %vm538_vm0, %v622_v63, %v598_v23  ;;  %v478_v29 = vsel %vm468_vm3, %v464_v40, 1326507024 }
  0x43   : > { %v401_v50 = vsel %vm2128_vm4, 0, %v2127_v42  ;;  %v2134_v28 = vmin.u32 %v602_v53, %v2652_v2  ;;  %v472_v33 = vsel %vm466_vm1, %v469_v59, %v471_v11  ;;  %v479_v35 = vsel %vm467_vm2, %v461_v49, %v478_v29 }
  0x44   : > { %v402_v55 = vsub.s32 32, %v401_v50  ;;  %v403_v57 = vshll.u32 %v2616_v7, %v401_v50  ;;  %v406_v58 = vsub.s32 4294967266, %v401_v50  ;;  %v419_v7 = vsel %vm2639_vm14, 0, %v417_v51 }
  0x45   : > { %v604_v56 = vclz %v2134_v28  ;;  %v480_v37 = vsel %vm466_vm1, %v477_v16, %v479_v35  ;;  %v649_v47 = vadd.s32 1, %v2632_v22  ;;  %v841_v17 = vadd.s32 3, %v419_v7 }
  0x46   : > { %v404_v3 = vshrl.u32 %v386_v15, %v402_v55  ;;  %v407_v60 = vadd.s32 127, %v406_v58  ;;  %v475_v15 = vsel %vm467_vm2, %v458_v48, %v474_v9  ;;  %v488_v49 = vmul.u32 %v2630_v21, %v472_v33 }
  0x47   : > { %v2135_v19 = vadd.s32 4294967294, %v604_v56  ;;  %v476_v20 = vsel %vm466_vm1, %v473_v8, %v475_v15  ;;  %v2704_v41 = vmul.u32.u64.low %v2630_v21, %v480_v37  ;;  %v2705_v42 = vmul.u32.u64.high %v2630_v21, %v480_v37, %v2704_v41 }
  0x48   : > { %v405_v12 = vor.u32 %v404_v3, %v403_v57  ;;  %v408_v27 = vshll.u32 %v407_v60, 23  ;;  %v2699_v23 = vmul.u32.u64.low %v2630_v21, %v476_v20  ;;  %v2700_v26 = vmul.u32.u64.high %v2630_v21, %v476_v20, %v2699_v23 }
  0x49   : > { %vm2136_vm6 = vcmp.lt.s32.totalorder %v2135_v19, 0  ;;  %vm650_vm7 = vcmp.gt.s32.totalorder %v649_v47, 0  ;;  %v2449_v54 = vmov 0.0   ;;  %v2717_v58 = vand.u32 3, %v419_v7 }
  0x4a   : > { %v409_v13 = vor.u32 4788187, %v408_v27  ;;  %v412_v14 = vcvt.s32.f32 %v405_v12  ;;  %v607_v25 = vsel %vm2136_vm6, 0, %v2135_v19  ;;  %v491_v53 = vadd.s32 1, %v2700_v26  ;;  %2217 = vmatprep.subr.bf16.mxu1 %v2449_v54  ;;  %2271 = vmatprep.subr.bf16.mxu0 %v2449_v54 }
  0x4b   : > { %v608_v43 = vsub.s32 32, %v607_v25  ;;  %v609_v44 = vshll.u32 %v2652_v2, %v607_v25  ;;  %v612_v45 = vsub.s32 4294967266, %v607_v25  ;;  %v625_v2 = vsel %vm2674_vm5, 0, %v623_v4 }
  0x4c   : > { %v410_v39 = vand.u32 2147483647, %v409_v13  ;;  %vm490_vm8 = vc.u32 %v2705_v42, %v2699_v23  ;;  %v651_v22 = vsel %vm650_vm7, %v649_v47, 0  ;;  %v2722_v28 = vand.u32 3, %v841_v17 }
  0x4d   : > { %v610_v50 = vshrl.u32 %v592_v62, %v608_v43  ;;  %v613_v51 = vadd.s32 127, %v612_v45  ;;  %v492_v61 = vsel %vm490_vm8, %v491_v53, %v2700_v26  ;;  %v653_v40 = vand.u32 31, %v651_v22 }
  0x4e   : > { %v413_v48 = vmul.f32 %v412_v14, %v410_v39  ;;  %v493_v63 = vadd.s32 %v492_v61, %v488_v49  ;;  %v1049_v9 = vadd.s32 3, %v625_v2  ;;  %v2727_v7 = vshrl.u32 %v651_v22, 5 }
  0x4f   : > { %v611_v57 = vor.u32 %v610_v50, %v609_v44  ;;  %v614_v21 = vshll.u32 %v613_v51, 23  ;;  %v654_v59 = vsub.s32 32, %v653_v40  ;;  %v656_v12 = vshll.u32 %v2443_v30, %v653_v40 }
  0x50   : > { %v414_v55 = vxor.u32 2147483648, %v413_v48  ;;  %v494_v56 = vadd.s32 536870912, %v493_v63  ;;  %v659_v27 = vshll.u32 %v2444_v32, %v653_v40  ;;  %vm428_vm9 = vcmp.eq.s32.totalorder %v2717_v58, 2 }
  0x51   : > { %v615_v60 = vor.u32 4788187, %v614_v21  ;;  %v618_v8 = vcvt.s32.f32 %v611_v57  ;;  %v657_v31 = vshrl.u32 %v2444_v32, %v654_v59  ;;  %v660_v16 = vshrl.u32 %v2445_v34, %v654_v59 }
  0x52   : > { %v415_v62 = vsel %vm332_vm13, %v414_v55, %v413_v48  ;;  %v2732_v15 = vshrl.u32 %v494_v56, 30  ;;  %v662_v19 = vshll.u32 %v2445_v34, %v653_v40  ;;  %vm844_vm10 = vcmp.eq.s32.totalorder %v2722_v28, 0 }
  0x53   : > { %v418_v3 = vsel %vm2639_vm14, %v2516_v0, %v415_v62  ;;  %v616_v11 = vand.u32 2147483647, %v615_v60  ;;  %vm425_vm11 = vcmp.eq.s32.totalorder %v2717_v58, 0  ;;  %v663_v20 = vshrl.u32 %v2446_v36, %v654_v59 }
  0x54   : > { %2403 = vcosq.f32 %v418_v3  ;;  %v665_v29 = vshll.u32 %v2446_v36, %v653_v40  ;;  %v666_v13 = vshrl.u32 %v2447_v38, %v654_v59  ;;  %vm843_vm12 = vcmp.lt.s32.totalorder %v2722_v28, 2 }
  0x55   : > { %2405 = vsinq.f32 %v418_v3  ;;  %v619_v4 = vmul.f32 %v618_v8, %v616_v11  ;;  %vm847_vm13 = vcmp.eq.s32.totalorder %v2722_v28, 2  ;;  %v2744_v32 = vand.u32 3, %v1049_v9  ;;  %v322_v3 = vld [vmem:[%s2779_s29] sm:$0xff] }
  0x56   : > { %vm424_vm14 = vcmp.lt.s32.totalorder %v2717_v58, 2  ;;  %v2747_v34 = vand.u32 3, %v625_v2  ;;  %v496_v14 = vshll.u32 %v2732_v15, 30  ;;  %vm422_vm15 = vweird.f32 %v2516_v0 }
  0x57   : > { %v620_v33 = vxor.u32 2147483648, %v619_v4  ;;  %v647_v35 = vor.u32 8388608, %v2626_v18  ;;  %v655_v36 = vshrl.u32 %v2443_v30, %v654_v59  ;;  %v668_v37 = vshll.u32 %v2447_v38, %v653_v40 }
  0x58   : > { %v2754_v26 = vsub.s32 %v493_v63, %v496_v14  ;;  %v658_v39 = vor.u32 %v657_v31, %v656_v12  ;;  %v667_v25 = vor.u32 %v666_v13, %v665_v29  ;;  %v669_v41 = vshrl.u32 %v2448_v46, %v654_v59 }
  0x59   : > { %v621_v43 = vsel %vm538_vm0, %v620_v33, %v619_v4  ;;  %v661_v44 = vor.u32 %v660_v16, %v659_v27  ;;  %v664_v45 = vor.u32 %v663_v20, %v662_v19  ;;  %vm674_vm1 = vcmp.lt.s32.totalorder %v2727_v7, 4 }
  0x5a   : > { %v624_v30 = vsel %vm2674_vm5, %v2519_v1, %v621_v43  ;;  %v499_v38 = vsub.s32 0, %v2754_v26  ;;  %v670_v18 = vor.u32 %v669_v41, %v668_v37  ;;  %vm671_vm2 = vcmp.lt.s32.totalorder %v2727_v7, 1  ;;  %v324_v43 = vld [vmem:[%s2779_s29 + $0x10] sm:$0x1] }
  0x5b   : > { %2407 = vcosq.f32 %v624_v30  ;;  %vm672_vm3 = vcmp.lt.s32.totalorder %v2727_v7, 2  ;;  %v676_v46 = vsel %vm674_vm1, %v664_v45, 2102212464  ;;  %v2768_v47 = vshll.u32 %v647_v35, 8 }
  0x5c   : > { %2409 = vsinq.f32 %v624_v30  ;;  %v2130_v17 = vmin.u32 %v499_v38, %v2754_v26  ;;  %vm673_vm0 = vcmp.lt.s32.totalorder %v2727_v7, 3  ;;  %v680_v10 = vsel %vm674_vm1, %v667_v25, 920167782 }
  0x5d   : > { %v675_v51 = vsel %vm671_vm2, %v655_v36, %v658_v39  ;;  %v679_v53 = vsel %vm671_vm2, %v658_v39, %v661_v44  ;;  %v683_v55 = vsel %vm671_vm2, %v661_v44, %v664_v45  ;;  %v677_v57 = vsel %vm673_vm0, %v661_v44, %v676_v46 }
  0x5e   : > { %v2404_v48 = vpop.eup %2403  ;;  %v501_v22 = vclz %v2130_v17  ;;  %v684_v21 = vsel %vm674_vm1, %v670_v18, 1326507024  ;;  %v681_v63 = vsel %vm673_vm0, %v664_v45, %v680_v10  ;;  %vm628_vm5 = vweird.f32 %v2519_v1 }
  0x5f   : > { %v2406_v49 = vpop.eup %2405  ;;  %v429_v50 = vxor.u32 2147483648, %v2404_v48  ;;  %v685_v40 = vsel %vm673_vm0, %v667_v25, %v684_v21  ;;  %v682_v19 = vsel %vm672_vm3, %v679_v53, %v681_v63  ;;  %vm1055_vm6 = vcmp.eq.s32.totalorder %v2744_v32, 2 }
  0x60   : > { %v426_v2 = vxor.u32 2147483648, %v2406_v49  ;;  %v2131_v9 = vadd.s32 4294967294, %v501_v22  ;;  %v686_v56 = vsel %vm672_vm3, %v683_v55, %v685_v40  ;;  %vm634_vm7 = vcmp.eq.s32.totalorder %v2747_v34, 2 }
  0x61   : > { %v849_v61 = vsel %vm847_vm13, %v429_v50, %v2406_v49  ;;  %v430_v62 = vsel %vm428_vm9, %v429_v50, %v2406_v49  ;;  %v2799_v12 = vmul.u32.u64.low %v2768_v47, %v686_v56  ;;  %v2800_v27 = vmul.u32.u64.high %v2768_v47, %v686_v56, %v2799_v12  ;;  %v2401_v50 = vld [vmem:[%s3372_s3] sm:$0x1f]  }
  0x62   : > { %v846_v60 = vsel %vm844_vm10, %v2404_v48, %v426_v2  ;;  %v427_v8 = vsel %vm425_vm11, %v2404_v48, %v426_v2  ;;  %vm2132_vm4 = vcmp.lt.s32.totalorder %v2131_v9, 0  ;;  %v678_v29 = vsel %vm672_vm3, %v675_v51, %v677_v57 }
  0x63   : > { %v850_v59 = vsel %vm843_vm12, %v846_v60, %v849_v61  ;;  %v431_v11 = vsel %vm424_vm14, %v427_v8, %v430_v62  ;;  %v504_v58 = vsel %vm2132_vm4, 0, %v2131_v9  ;;  %v489_v13 = vadd.s32 %v2699_v23, %v2705_v42  ;;  %v2402_v61 = vld [vmem:[%s3371_s2] sm:$0x1f]  }
  0x64   : > { %v851_v31 = vsel %vm422_vm15, nan, %v850_v59  ;;  %v432_v16 = vsel %vm422_vm15, nan, %v431_v11  ;;  %v509_v20 = vsub.s32 4294967266, %v504_v58  ;;  %v505_v14 = vsub.s32 32, %v504_v58 }
  0x65   : > { %v1164_v28 = vmul.f32 %v851_v31, %v322_v3  ;;  %v2809_v4 = vmul.f32 %v432_v16, %v322_v3  ;;  %v2408_v0 = vpop.eup %2407  ;;  %v2818_v33 = vmul.u32.u64.low %v2768_v47, %v682_v19  ;;  %v2819_v35 = vmul.u32.u64.high %v2768_v47, %v682_v19, %v2818_v33 }
  0x66   : > { %v2410_v36 = vpop.eup %2409  ;;  %v635_v37 = vxor.u32 2147483648, %v2408_v0  ;;  %vm1052_vm8 = vcmp.eq.s32.totalorder %v2744_v32, 0  ;;  %vm631_vm9 = vcmp.eq.s32.totalorder %v2747_v34, 0  ;;  %v510_v39 = vadd.s32 127, %v509_v20 }
  0x67   : > { %v632_v7 = vxor.u32 2147483648, %v2410_v36  ;;  %vm1051_vm10 = vcmp.lt.s32.totalorder %v2744_v32, 2  ;;  %vm630_vm11 = vcmp.lt.s32.totalorder %v2747_v34, 2  ;;  %v694_v23 = vmul.u32 %v2768_v47, %v678_v29 }
  0x68   : > { %v1057_v42 = vsel %vm1055_vm6, %v635_v37, %v2410_v36  ;;  %v636_v25 = vsel %vm634_vm7, %v635_v37, %v2410_v36  ;;  %v506_v41 = vshll.u32 %v2754_v26, %v504_v58  ;;  %vm696_vm12 = vc.u32 %v2800_v27, %v2818_v33 }
  0x69   : > { %v1054_v44 = vsel %vm1052_vm8, %v2408_v0, %v632_v7  ;;  %v633_v45 = vsel %vm631_vm9, %v2408_v0, %v632_v7  ;;  %v507_v30 = vshrl.u32 %v489_v13, %v505_v14  ;;  %v697_v38 = vadd.s32 1, %v2819_v35 }
  0x6a   : > { %v1058_v18 = vsel %vm1051_vm10, %v1054_v44, %v1057_v42  ;;  %v637_v46 = vsel %vm630_vm11, %v633_v45, %v636_v25  ;;  %v511_v47 = vshll.u32 %v510_v39, 23  ;;  %vm1251_vm13 = vcmask 1043456  }
  0x6b   : > { %v1059_v32 = vsel %vm628_vm5, nan, %v1058_v18  ;;  %v638_v34 = vsel %vm628_vm5, nan, %v637_v46  ;;  %v698_v26 = vsel %vm696_vm12, %v697_v38, %v2819_v35  ;;  %v508_v49 = vor.u32 %v507_v30, %v506_v41 }
  0x6c   : > { %v1166_v48 = vmul.f32 %v1059_v32, %v324_v43  ;;  %v2841_v17 = vmul.f32 %v638_v34, %v324_v43  ;;  %v699_v10 = vadd.s32 %v698_v26, %v694_v23  ;;  %vm1252_vm14 = vcmask 1044480  }
  0x6d   : > { %v512_v55 = vor.u32 4788187, %v511_v47  ;;  %vm2450_vm15 = vmmov 0   ;;  %v2451_v2 = vmov 65535   ;;  %v515_v40 = vcvt.s32.f32 %v508_v49 }
  0x6e   : > { %v1168_v51 = vpack.c.bf16 %v1166_v48, %v1164_v28  ;;  %v746_v53 = vpack.c.bf16 %v2841_v17, %v2809_v4  ;;  %v700_v1 = vadd.s32 536870912, %v699_v10  ;;  %2219 = vmatprep.mubr.msk.bf16.mxu1 %vm2450_vm15, %v2449_v54  ;;  %2273 = vmatprep.mubr.msk.bf16.mxu0 %vm2450_vm15, %v2449_v54  ;;  %v1253_v22 = vsel %vm1251_vm13, 4294967295, %v2451_v2 }
  0x6f   : > { %v1254_v21 = vsel %vm1252_vm14, %v1253_v22, 0  ;;  %v513_v63 = vand.u32 2147483647, %v512_v55  ;;  %vm435_vm1 = vcmp.lt.s32.totalorder %v2526_v6, 0  ;;  %vm2858_vm2 = vcmp.le.f32.partialorder %v433_v24, 0.7853982 }
  0x70   : > { %1174 = vxpose.xlu0.c.b16.start.end [1/1] (short) %v1168_v51, 128  ;;  %v701_v57 = vshrl.u32 %v700_v1, 30  ;;  %v1256_v62 = vand.u32 %v2401_v50, %v1254_v21  ;;  %v1471_v60 = vand.u32 %v2402_v61, %v1254_v21  ;;  %v695_v28 = vadd.s32 %v2818_v33, %v2800_v27  ;;  %v323_v50 = vld [vmem:[%s2779_s29 + $0x8] sm:$0xff]  ;;  %v325_v1 = vld [vmem:[%s2779_s29 + $0x18] sm:$0x1] }
  0x71   : > { %v516_v9 = vmul.f32 %v515_v40, %v513_v63  ;;  %v519_v0 = vsub.s32 4, %v2732_v15  ;;  %vm641_vm0 = vcmp.lt.s32.totalorder %v2592_v52, 0  ;;  %vm640_vm4 = vcmp.le.f32.partialorder %v639_v5, 0.7853982 }
  0x72   : > { %v702_v3 = vshll.u32 %v701_v57, 30  ;;  %2218 = vmatpush3.bf16.msra.mxu1 %v1256_v62  ;;  %2272 = vmatpush3.bf16.msra.mxu0 %v1471_v60  ;;  %v725_v23 = vsub.s32 4, %v701_v57  ;;  %vm525_vm8 = vweird.f32 %v2526_v6  ;;  %vm731_vm12 = vweird.f32 %v2592_v52 }
  0x73   : > { %v517_v11 = vxor.u32 2147483648, %v516_v9  ;;  %v520_v27 = vsel %vm435_vm1, %v519_v0, %v2732_v15 }
  0x74   : > { %v703_v8 = vsub.s32 %v699_v10, %v702_v3  ;;  %v522_v39 = vsel %vm2858_vm2, 0, %v520_v27  ;;  %v726_v43 = vsel %vm641_vm0, %v725_v23, %v701_v57 }
  0x75   : > { %v518_v19 = vsel %vm435_vm1, %v517_v11, %v516_v9  ;;  %v945_v25 = vadd.s32 3, %v522_v39  ;;  %v728_v38 = vsel %vm640_vm4, 0, %v726_v43  ;;  %v526_v22 = vand.u32 3, %v522_v39 }
  0x76   : > { %v705_v56 = vsub.s32 0, %v703_v8  ;;  %v521_v24 = vsel %vm2858_vm2, %v2526_v6, %v518_v19  ;;  %v1153_v32 = vadd.s32 3, %v728_v38  ;;  %v732_v57 = vand.u32 3, %v728_v38 }
  0x77   : > { %2411 = vcosq.f32 %v521_v24  ;;  %v946_v18 = vand.u32 3, %v945_v25  ;;  %vm528_vm13 = vcmp.eq.s32.totalorder %v526_v22, 0  ;;  %vm531_vm14 = vcmp.eq.s32.totalorder %v526_v22, 2 }
  0x78   : > { %v2138_v59 = vmin.u32 %v705_v56, %v703_v8  ;;  %2413 = vsinq.f32 %v521_v24  ;;  %v1154_v26 = vand.u32 3, %v1153_v32  ;;  %vm734_vm1 = vcmp.eq.s32.totalorder %v732_v57, 0 }
  0x79   : > { %vm948_vm5 = vcmp.eq.s32.totalorder %v946_v18, 0  ;;  %vm951_vm6 = vcmp.eq.s32.totalorder %v946_v18, 2  ;;  %vm947_vm7 = vcmp.lt.s32.totalorder %v946_v18, 2  ;;  %vm737_vm2 = vcmp.eq.s32.totalorder %v732_v57, 2 }
  0x7a   : > { %v707_v12 = vclz %v2138_v59  ;;  %vm1159_vm9 = vcmp.eq.s32.totalorder %v1154_v26, 2  ;;  %vm1156_vm10 = vcmp.eq.s32.totalorder %v1154_v26, 0  ;;  %vm1155_vm11 = vcmp.lt.s32.totalorder %v1154_v26, 2 }
  0x7c   : > { %v2139_v31 = vadd.s32 4294967294, %v707_v12 }
  0x7e   : > { %vm2140_vm3 = vcmp.lt.s32.totalorder %v2139_v31, 0 }
  0x7f   : > { %v710_v4 = vsel %vm2140_vm3, 0, %v2139_v31  ;;  %vm527_vm3 = vcmp.lt.s32.totalorder %v526_v22, 2 }
  0x80   : > { %v711_v58 = vsub.s32 32, %v710_v4  ;;  %v712_v20 = vshll.u32 %v703_v8, %v710_v4  ;;  %v715_v29 = vsub.s32 4294967266, %v710_v4 }
  0x81   : > { %v2412_v44 = vpop.eup %2411 }
  0x82   : > { %v713_v13 = vshrl.u32 %v695_v28, %v711_v58  ;;  %v716_v14 = vadd.s32 127, %v715_v29  ;;  %v2414_v45 = vpop.eup %2413  ;;  %v532_v47 = vxor.u32 2147483648, %v2412_v44 }
  0x83   : > { %v529_v46 = vxor.u32 2147483648, %v2414_v45 }
  0x84   : > { %v714_v35 = vor.u32 %v713_v13, %v712_v20  ;;  %v717_v36 = vshll.u32 %v716_v14, 23  ;;  %v953_v34 = vsel %vm951_vm6, %v532_v47, %v2414_v45  ;;  %v533_v60 = vsel %vm531_vm14, %v532_v47, %v2414_v45 }
  0x85   : > { %v950_v5 = vsel %vm948_vm5, %v2412_v44, %v529_v46  ;;  %v530_v3 = vsel %vm528_vm13, %v2412_v44, %v529_v46  ;;  %vm295_vm5 = vcmask 64512  }
  0x86   : > { %v718_v33 = vor.u32 4788187, %v717_v36  ;;  %v721_v37 = vcvt.s32.f32 %v714_v35  ;;  %v954_v48 = vsel %vm947_vm7, %v950_v5, %v953_v34  ;;  %v534_v56 = vsel %vm527_vm3, %v530_v3, %v533_v60  ;;  %1635 = vst.msk [vmem:[#allocation2 + $0xc8] sm:$0xff] %vm295_vm5, %v2449_v54  ;;  %296 = vst.msk [vmem:[%s2971_s13] sm:$0xff] %vm295_vm5, %v2449_v54 }
  0x87   : > { %v535_v11 = vsel %vm525_vm8, nan, %v534_v56  ;;  %297 = vst.msk [vmem:[%s2971_s13 + $0x8] sm:$0xff] %vm295_vm5, %v2449_v54  ;;  %298 = vst.msk [vmem:[%s2971_s13 + $0x10] sm:$0xff] %vm295_vm5, %v2449_v54 }
  0x88   : > { %v719_v7 = vand.u32 2147483647, %v718_v33  ;;  %v743_v31 = vmul.f32 %v535_v11, %v323_v50  ;;  %299 = vst.msk [vmem:[%s2971_s13 + $0x18] sm:$0xff] %vm295_vm5, %v2449_v54  ;;  %300 = vst.msk [vmem:[%s2971_s13 + $0x20] sm:$0xff] %vm295_vm5, %v2449_v54 }
  0x89   : > { %301 = vst.msk [vmem:[%s2971_s13 + $0x28] sm:$0xff] %vm295_vm5, %v2449_v54  ;;  %302 = vst.msk [vmem:[%s2971_s13 + $0x30] sm:$0xff] %vm295_vm5, %v2449_v54 }
  0x8a   : > { %v722_v42 = vmul.f32 %v721_v37, %v719_v7  ;;  %303 = vst.msk [vmem:[%s2971_s13 + $0x38] sm:$0xff] %vm295_vm5, %v2449_v54  ;;  %304 = vst.msk [vmem:[%s2971_s13 + $0x40] sm:$0xff] %vm295_vm5, %v2449_v54 }
  0x8b   : > { %305 = vst.msk [vmem:[%s2971_s13 + $0x48] sm:$0xff] %vm295_vm5, %v2449_v54  ;;  %306 = vst.msk [vmem:[%s2971_s13 + $0x50] sm:$0xff] %vm295_vm5, %v2449_v54 }
  0x8c   : > { %v723_v41 = vxor.u32 2147483648, %v722_v42  ;;  %307 = vst.msk [vmem:[%s2971_s13 + $0x58] sm:$0xff] %vm295_vm5, %v2449_v54  ;;  %308 = vst.msk [vmem:[%s2971_s13 + $0x60] sm:$0xff] %vm295_vm5, %v2449_v54 }
  0x8d   : > { %1394 = vxpose.xlu0.c.b16.start.end [1/1] (short) %v746_v53, 128  ;;  %v955_v53 = vsel %vm525_vm8, nan, %v954_v48  ;;  %309 = vst.msk [vmem:[%s2971_s13 + $0x68] sm:$0xff] %vm295_vm5, %v2449_v54  ;;  %310 = vst.msk [vmem:[%s2971_s13 + $0x70] sm:$0xff] %vm295_vm5, %v2449_v54 }
  0x8e   : > { %v724_v15 = vsel %vm641_vm0, %v723_v41, %v722_v42  ;;  %v1165_v61 = vmul.f32 %v955_v53, %v323_v50  ;;  %vm733_vm0 = vcmp.lt.s32.totalorder %v732_v57, 2  ;;  %311 = vst.msk [vmem:[%s2971_s13 + $0x78] sm:$0xff] %vm295_vm5, %v2449_v54  ;;  %312 = vst.msk [vmem:[%s2971_s13 + $0x80] sm:$0xff] %vm295_vm5, %v2449_v54 }
  0x8f   : > { %v727_v30 = vsel %vm640_vm4, %v2592_v52, %v724_v15  ;;  %vm1211_vm4 = vcmask 72704   ;;  %313 = vst.msk [vmem:[%s2971_s13 + $0x88] sm:$0xff] %vm295_vm5, %v2449_v54  ;;  %314 = vst.msk [vmem:[%s2971_s13 + $0x90] sm:$0xff] %vm295_vm5, %v2449_v54 }
  0x90   : > { %2415 = vcosq.f32 %v727_v30  ;;  %315 = vst.msk [vmem:[%s2971_s13 + $0x98] sm:$0xff] %vm295_vm5, %v2449_v54  ;;  %316 = vst.msk [vmem:[%s2971_s13 + $0xa0] sm:$0xff] %vm295_vm5, %v2449_v54 }
  0x91   : > { %2417 = vsinq.f32 %v727_v30  ;;  %317 = vst.msk [vmem:[%s2971_s13 + $0xa8] sm:$0xff] %vm295_vm5, %v2449_v54  ;;  %318 = vst.msk [vmem:[%s2971_s13 + $0xb0] sm:$0xff] %vm295_vm5, %v2449_v54 }
  0x92   : > { %319 = vst.msk [vmem:[%s2971_s13 + $0xb8] sm:$0xff] %vm295_vm5, %v2449_v54  ;;  %320 = vst.msk [vmem:[%s2971_s13 + $0xc0] sm:$0xff] %vm295_vm5, %v2449_v54 }
  0x93   : > { %321 = vst.msk [vmem:[%s2971_s13 + $0xc8] sm:$0xff] %vm295_vm5, %v2449_v54 }
  0x9a   : > { %v2416_v17 = vpop.eup %2415 }
  0x9b   : > { %v2418_v10 = vpop.eup %2417  ;;  %v738_v49 = vxor.u32 2147483648, %v2416_v17 }
  0x9c   : > { %v735_v51 = vxor.u32 2147483648, %v2418_v10 }
  0x9d   : > { %v1161_v55 = vsel %vm1159_vm9, %v738_v49, %v2418_v10  ;;  %v739_v9 = vsel %vm737_vm2, %v738_v49, %v2418_v10 }
  0x9e   : > { %v1158_v2 = vsel %vm1156_vm10, %v2416_v17, %v735_v51  ;;  %v736_v8 = vsel %vm734_vm1, %v2416_v17, %v735_v51 }
  0x9f   : > { %v1162_v21 = vsel %vm1155_vm11, %v1158_v2, %v1161_v55  ;;  %v740_v59 = vsel %vm733_vm0, %v736_v8, %v739_v9 }
  0xa0   : > { %v1163_v62 = vsel %vm731_vm12, nan, %v1162_v21  ;;  %v741_v12 = vsel %vm731_vm12, nan, %v740_v59 }
  0xa1   : > { %v1167_v63 = vmul.f32 %v1163_v62, %v325_v1  ;;  %v745_v16 = vmul.f32 %v741_v12, %v325_v1 }
  0xa3   : > { %v1169_v40 = vpack.c.bf16 %v1167_v63, %v1165_v61  ;;  %v747_v19 = vpack.c.bf16 %v745_v16, %v743_v31 }
  0xa5   : > { %1190 = vxpose.xlu1.c.b16.start.end [1/1] (short) (narrow) %v1169_v40, 80 }
  0xb6   : > { %1410 = vxpose.xlu1.c.b16.start.end [1/1] (short) (narrow) %v747_v19, 80 }
  0xd6   : > { %v1182_v28 = vpop.trf.xlu0 }
  0xd7   : > { %2220 = vmatmul.mubr.msk.bf16.vlgmr.msra.gmra.mrb[0].mxu1 %vm1211_vm4, %v1182_v28 }
  0xd8   : > { %2223 = vmatprep.mubr.msk.bf16.mxu1 %vm2450_vm15, %v2449_v54 }
  0xda   : > { %v1183_v4 = vpop.trf.xlu0 }
  0xde   : > { %v1184_v58 = vpop.trf.xlu0 }
  0xdf   : > { %2224 = vmatmul.mubr.msk.bf16.gmra.mrb[4].mxu1 %vm1211_vm4, %v1183_v4 }
  0xe0   : > { %2227 = vmatprep.mubr.msk.bf16.mxu1 %vm2450_vm15, %v2449_v54 }
  0xe2   : > { %v1185_v6 = vpop.trf.xlu0 }
  0xe6   : > { %v1186_v52 = vpop.trf.xlu0 }
  0xe7   : > { %2228 = vmatmul.mubr.msk.bf16.gmra.mrb[8].mxu1 %vm1211_vm4, %v1184_v58 }
  0xe8   : > { %2231 = vmatprep.mubr.msk.bf16.mxu1 %vm2450_vm15, %v2449_v54 }
  0xea   : > { %v1187_v20 = vpop.trf.xlu0 }
  0xee   : > { %v1188_v29 = vpop.trf.xlu0 }
  0xef   : > { %2232 = vmatmul.mubr.msk.bf16.gmra.mrb[12].mxu1 %vm1211_vm4, %v1185_v6 }
  0xf0   : > { %2235 = vmatprep.mubr.msk.bf16.mxu1 %vm2450_vm15, %v2449_v54 }
  0xf2   : > { %v1189_v0 = vpop.trf.xlu0 }
  0xf6   : > { %v1402_v24 = vpop.trf.xlu0 }
  0xf7   : > { %2236 = vmatmul.mubr.msk.bf16.gmra.mrb[16].mxu1 %vm1211_vm4, %v1186_v52  ;;  %2274 = vmatmul.mubr.msk.bf16.vlgmr.msra.gmra.mrb[0].mxu0 %vm1211_vm4, %v1402_v24 }
  0xf8   : > { %2239 = vmatprep.mubr.msk.bf16.mxu1 %vm2450_vm15, %v2449_v54  ;;  %2277 = vmatprep.mubr.msk.bf16.mxu0 %vm2450_vm15, %v2449_v54 }
  0xfa   : > { %v1403_v13 = vpop.trf.xlu0 }
  0xfe   : > { %v1404_v14 = vpop.trf.xlu0 }
  0xff   : > { %2240 = vmatmul.mubr.msk.bf16.gmra.mrb[20].mxu1 %vm1211_vm4, %v1187_v20  ;;  %2278 = vmatmul.mubr.msk.bf16.gmra.mrb[4].mxu0 %vm1211_vm4, %v1403_v13 }
 0x100   : > { %2243 = vmatprep.mubr.msk.bf16.mxu1 %vm2450_vm15, %v2449_v54  ;;  %2281 = vmatprep.mubr.msk.bf16.mxu0 %vm2450_vm15, %v2449_v54 }
 0x102   : > { %v1405_v35 = vpop.trf.xlu0 }
 0x106   : > { %v1406_v27 = vpop.trf.xlu0 }
 0x107   : > { %2244 = vmatmul.mubr.msk.bf16.gmra.mrb[24].mxu1 %vm1211_vm4, %v1188_v29  ;;  %2282 = vmatmul.mubr.msk.bf16.gmra.mrb[8].mxu0 %vm1211_vm4, %v1404_v14 }
 0x108   : > { %2247 = vmatprep.mubr.msk.bf16.mxu1 %vm2450_vm15, %v2449_v54  ;;  %2285 = vmatprep.mubr.msk.bf16.mxu0 %vm2450_vm15, %v2449_v54 }
 0x10a   : > { %v1407_v37 = vpop.trf.xlu0 }
 0x10b   : > { %v1198_v36 = vpop.trf.xlu1 }
 0x10e   : > { %v1408_v7 = vpop.trf.xlu0 }
 0x10f   : > { %2248 = vmatmul.mubr.msk.bf16.gmra.mrb[28].mxu1 %vm1211_vm4, %v1189_v0  ;;  %2286 = vmatmul.mubr.msk.bf16.gmra.mrb[12].mxu0 %vm1211_vm4, %v1405_v35  ;;  %v1199_v33 = vpop.trf.xlu1 }
 0x110   : > { %2251 = vmatprep.mubr.msk.bf16.mxu1 %vm2450_vm15, %v2449_v54  ;;  %2289 = vmatprep.mubr.msk.bf16.mxu0 %vm2450_vm15, %v2449_v54 }
 0x112   : > { %v1409_v42 = vpop.trf.xlu0 }
 0x113   : > { %v1200_v39 = vpop.trf.xlu1 }
 0x117   : > { %2252 = vmatmul.mubr.msk.bf16.gmra.mrb[32].mxu1 %vm1211_vm4, %v1198_v36  ;;  %2290 = vmatmul.mubr.msk.bf16.gmra.mrb[16].mxu0 %vm1211_vm4, %v1406_v27  ;;  %v1201_v23 = vpop.trf.xlu1 }
 0x118   : > { %2255 = vmatprep.mubr.msk.bf16.mxu1 %vm2450_vm15, %v2449_v54  ;;  %2293 = vmatprep.mubr.msk.bf16.mxu0 %vm2450_vm15, %v2449_v54 }
 0x11b   : > { %v1202_v25 = vpop.trf.xlu1 }
 0x11f   : > { %2256 = vmatmul.mubr.msk.bf16.gmra.mrb[36].mxu1 %vm1211_vm4, %v1199_v33  ;;  %2294 = vmatmul.mubr.msk.bf16.gmra.mrb[20].mxu0 %vm1211_vm4, %v1407_v37  ;;  %v1418_v41 = vpop.trf.xlu1 }
 0x120   : > { %2259 = vmatprep.mubr.msk.bf16.mxu1 %vm2450_vm15, %v2449_v54  ;;  %2297 = vmatprep.mubr.msk.bf16.mxu0 %vm2450_vm15, %v2449_v54 }
 0x123   : > { %v1419_v43 = vpop.trf.xlu1 }
 0x127   : > { %2260 = vmatmul.mubr.msk.bf16.gmra.mrb[40].mxu1 %vm1211_vm4, %v1200_v39  ;;  %2298 = vmatmul.mubr.msk.bf16.gmra.mrb[24].mxu0 %vm1211_vm4, %v1408_v7  ;;  %v1420_v44 = vpop.trf.xlu1 }
 0x128   : > { %2263 = vmatprep.mubr.msk.bf16.mxu1 %vm2450_vm15, %v2449_v54  ;;  %2301 = vmatprep.mubr.msk.bf16.mxu0 %vm2450_vm15, %v2449_v54 }
 0x12b   : > { %v1421_v15 = vpop.trf.xlu1 }
 0x12f   : > { %2264 = vmatmul.mubr.msk.bf16.gmra.mrb[44].mxu1 %vm1211_vm4, %v1201_v23  ;;  %2302 = vmatmul.mubr.msk.bf16.gmra.mrb[28].mxu0 %vm1211_vm4, %v1409_v42  ;;  %v1422_v45 = vpop.trf.xlu1 }
 0x130   : > { %2267 = vmatprep.mubr.msk.bf16.mxu1 %vm2450_vm15, %v2449_v54  ;;  %2305 = vmatprep.mubr.msk.bf16.mxu0 %vm2450_vm15, %v2449_v54 }
 0x137   : > { %2268 = vmatmul.mubr.msk.bf16.gmra.mrb[48].mxu1 %vm1211_vm4, %v1202_v25  ;;  %2306 = vmatmul.mubr.msk.bf16.gmra.mrb[32].mxu0 %vm1211_vm4, %v1418_v41 }
 0x138   : > { %2309 = vmatprep.mubr.msk.bf16.mxu0 %vm2450_vm15, %v2449_v54 }
 0x13f   : > { %2310 = vmatmul.mubr.msk.bf16.gmra.mrb[36].mxu0 %vm1211_vm4, %v1419_v43 }
 0x140   : > { %2313 = vmatprep.mubr.msk.bf16.mxu0 %vm2450_vm15, %v2449_v54 }
 0x147   : > { %2314 = vmatmul.mubr.msk.bf16.gmra.mrb[40].mxu0 %vm1211_vm4, %v1420_v44 }
 0x148   : > { %2317 = vmatprep.mubr.msk.bf16.mxu0 %vm2450_vm15, %v2449_v54 }
 0x14f   : > { %2318 = vmatmul.mubr.msk.bf16.gmra.mrb[44].mxu0 %vm1211_vm4, %v1421_v15 }
 0x150   : > { %2321 = vmatprep.mubr.msk.bf16.mxu0 %vm2450_vm15, %v2449_v54 }
 0x157   : > { %2322 = vmatmul.mubr.msk.bf16.gmra.mrb[48].mxu0 %vm1211_vm4, %v1422_v45 }
 0x1aa   : > { %v1292_v30 = vpop.f32.mrb[0].mxu1 }
 0x1ab   : > { %v2221_v38 = vpop.f32.mrb[1].mxu1 }
 0x1ac   : > { %v1295_v18 = vpop.f32.mrb[2].mxu1 }
 0x1ad   : > { %v2222_v46 = vpop.f32.mrb[3].mxu1 }
 0x1b2   : > { %v1300_v47 = vpop.f32.mrb[4].mxu1 }
 0x1b3   : > { %v2225_v32 = vpop.f32.mrb[5].mxu1 }
 0x1b4   : > { %v1303_v5 = vpop.f32.mrb[6].mxu1 }
 0x1b5   : > { %v2226_v34 = vpop.f32.mrb[7].mxu1 }
 0x1ba   : > { %v1308_v26 = vpop.f32.mrb[8].mxu1 }
 0x1bb   : > { %v2229_v48 = vpop.f32.mrb[9].mxu1 }
 0x1bc   : > { %v1311_v17 = vpop.f32.mrb[10].mxu1 }
 0x1bd   : > { %v2230_v10 = vpop.f32.mrb[11].mxu1 }
 0x1c2   : > { %v1316_v49 = vpop.f32.mrb[12].mxu1 }
 0x1c3   : > { %v2233_v50 = vpop.f32.mrb[13].mxu1 }
 0x1c4   : > { %v1319_v51 = vpop.f32.mrb[14].mxu1 }
 0x1c5   : > { %v2234_v53 = vpop.f32.mrb[15].mxu1 }
 0x1ca   : > { %v1324_v55 = vpop.f32.mrb[16].mxu1  ;;  %v1507_v1 = vpop.f32.mrb[0].mxu0 }
 0x1cb   : > { %v1508_v2 = vadd.f32 %v1507_v1, %v1292_v30  ;;  %v2237_v22 = vpop.f32.mrb[17].mxu1  ;;  %v2275_v57 = vpop.f32.mrb[1].mxu0 }
 0x1cc   : > { %v1327_v21 = vpop.f32.mrb[18].mxu1  ;;  %v1510_v61 = vpop.f32.mrb[2].mxu0 }
 0x1cd   : > { %1610 = vst.msk [vmem:[#allocation2] sm:$0xff] %vm295_vm5, %v1508_v2  ;;  %v1511_v62 = vadd.f32 %v1510_v61, %v1295_v18  ;;  %v2238_v63 = vpop.f32.mrb[19].mxu1  ;;  %1686 = vrot.lane.b32.xlu1 %v1508_v2, %s2452_s14  ;;  %v2276_v54 = vpop.f32.mrb[3].mxu0 }
 0x1cf   : > { %1611 = vst.msk [vmem:[#allocation2 + $0x8] sm:$0xff] %vm295_vm5, %v1511_v62  ;;  %1688 = vrot.lane.b32.xlu0 %v1511_v62, %s2452_s14 }
 0x1d2   : > { %v1332_v40 = vpop.f32.mrb[20].mxu1  ;;  %v1515_v3 = vpop.f32.mrb[4].mxu0 }
 0x1d3   : > { %v1516_v60 = vadd.f32 %v1515_v3, %v1300_v47  ;;  %v2241_v8 = vpop.f32.mrb[21].mxu1  ;;  %v2279_v9 = vpop.f32.mrb[5].mxu0 }
 0x1d4   : > { %v1335_v56 = vpop.f32.mrb[22].mxu1  ;;  %v1518_v59 = vpop.f32.mrb[6].mxu0 }
 0x1d5   : > { %1612 = vst.msk [vmem:[#allocation2 + $0x10] sm:$0xff] %vm295_vm5, %v1516_v60  ;;  %v1519_v11 = vadd.f32 %v1518_v59, %v1303_v5  ;;  %v2242_v12 = vpop.f32.mrb[23].mxu1  ;;  %1690 = vrot.lane.b32.xlu1 %v1516_v60, %s2452_s14  ;;  %v2280_v31 = vpop.f32.mrb[7].mxu0 }
 0x1d7   : > { %1613 = vst.msk [vmem:[#allocation2 + $0x18] sm:$0xff] %vm295_vm5, %v1519_v11 }
 0x1d9   : > { %1692 = vrot.lane.b32.xlu1 %v1519_v11, %s2452_s14 }
 0x1da   : > { %v1340_v16 = vpop.f32.mrb[24].mxu1  ;;  %v1523_v19 = vpop.f32.mrb[8].mxu0 }
 0x1db   : > { %v1524_v28 = vadd.f32 %v1523_v19, %v1308_v26  ;;  %v2245_v4 = vpop.f32.mrb[25].mxu1  ;;  %v2283_v58 = vpop.f32.mrb[9].mxu0 }
 0x1dc   : > { %v1343_v6 = vpop.f32.mrb[26].mxu1  ;;  %v1526_v52 = vpop.f32.mrb[10].mxu0 }
 0x1dd   : > { %1614 = vst.msk [vmem:[#allocation2 + $0x20] sm:$0xff] %vm295_vm5, %v1524_v28  ;;  %v1527_v20 = vadd.f32 %v1526_v52, %v1311_v17  ;;  %v2246_v29 = vpop.f32.mrb[27].mxu1  ;;  %1694 = vrot.lane.b32.xlu1 %v1524_v28, %s2452_s14  ;;  %v2284_v0 = vpop.f32.mrb[11].mxu0 }
 0x1df   : > { %1615 = vst.msk [vmem:[#allocation2 + $0x28] sm:$0xff] %vm295_vm5, %v1527_v20 }
 0x1e1   : > { %1696 = vrot.lane.b32.xlu1 %v1527_v20, %s2452_s14 }
 0x1e2   : > { %v1348_v24 = vpop.f32.mrb[28].mxu1  ;;  %v1531_v13 = vpop.f32.mrb[12].mxu0 }
 0x1e3   : > { %v1532_v14 = vadd.f32 %v1531_v13, %v1316_v49  ;;  %v2249_v35 = vpop.f32.mrb[29].mxu1  ;;  %v2287_v36 = vpop.f32.mrb[13].mxu0 }
 0x1e4   : > { %v1351_v27 = vpop.f32.mrb[30].mxu1  ;;  %v1534_v33 = vpop.f32.mrb[14].mxu0 }
 0x1e5   : > { %1616 = vst.msk [vmem:[#allocation2 + $0x30] sm:$0xff] %vm295_vm5, %v1532_v14  ;;  %v1535_v37 = vadd.f32 %v1534_v33, %v1319_v51  ;;  %v2250_v39 = vpop.f32.mrb[31].mxu1  ;;  %1698 = vrot.lane.b32.xlu1 %v1532_v14, %s2452_s14  ;;  %v2288_v7 = vpop.f32.mrb[15].mxu0 }
 0x1e7   : > { %1617 = vst.msk [vmem:[#allocation2 + $0x38] sm:$0xff] %vm295_vm5, %v1535_v37 }
 0x1e9   : > { %1700 = vrot.lane.b32.xlu1 %v1535_v37, %s2452_s14 }
 0x1ea   : > { %v1539_v23 = vpop.f32.mrb[16].mxu0  ;;  %v1356_v42 = vpop.f32.mrb[32].mxu1 }
 0x1eb   : > { %v1540_v25 = vadd.f32 %v1539_v23, %v1324_v55  ;;  %v2291_v41 = vpop.f32.mrb[17].mxu0  ;;  %v2253_v43 = vpop.f32.mrb[33].mxu1 }
 0x1ec   : > { %v1542_v44 = vpop.f32.mrb[18].mxu0  ;;  %v1359_v15 = vpop.f32.mrb[34].mxu1 }
 0x1ed   : > { %1618 = vst.msk [vmem:[#allocation2 + $0x40] sm:$0xff] %vm295_vm5, %v1540_v25  ;;  %v1543_v45 = vadd.f32 %v1542_v44, %v1327_v21  ;;  %1702 = vrot.lane.b32.xlu1 %v1540_v25, %s2452_s14  ;;  %v2292_v30 = vpop.f32.mrb[19].mxu0  ;;  %v2254_v38 = vpop.f32.mrb[35].mxu1 }
 0x1ef   : > { %1619 = vst.msk [vmem:[#allocation2 + $0x48] sm:$0xff] %vm295_vm5, %v1543_v45 }
 0x1f1   : > { %1704 = vrot.lane.b32.xlu1 %v1543_v45, %s2452_s14 }
 0x1f2   : > { %v1547_v18 = vpop.f32.mrb[20].mxu0  ;;  %v1364_v46 = vpop.f32.mrb[36].mxu1 }
 0x1f3   : > { %v1548_v47 = vadd.f32 %v1547_v18, %v1332_v40  ;;  %v2295_v32 = vpop.f32.mrb[21].mxu0  ;;  %v2257_v5 = vpop.f32.mrb[37].mxu1  ;;  %v1636_v18 = vld [vmem:[#allocation2 + $0x1] sm:$0xff] }
 0x1f4   : > { %v1550_v34 = vpop.f32.mrb[22].mxu0  ;;  %v1367_v26 = vpop.f32.mrb[38].mxu1 }
 0x1f5   : > { %1620 = vst.msk [vmem:[#allocation2 + $0x50] sm:$0xff] %vm295_vm5, %v1548_v47  ;;  %v1551_v48 = vadd.f32 %v1550_v34, %v1335_v56  ;;  %1706 = vrot.lane.b32.xlu0 %v1548_v47, %s2452_s14  ;;  %v2296_v17 = vpop.f32.mrb[23].mxu0  ;;  %v2258_v10 = vpop.f32.mrb[39].mxu1  ;;  %v1637_v47 = vld [vmem:[#allocation2 + $0x9] sm:$0xff]  ;;  %v1813_v34 = vld [vmem:[%s2971_s13] sm:$0xff] }
 0x1f7   : > { %1621 = vst.msk [vmem:[#allocation2 + $0x58] sm:$0xff] %vm295_vm5, %v1551_v48  ;;  %1708 = vrot.lane.b32.xlu1 %v1551_v48, %s2452_s14  ;;  %v1638_v48 = vld [vmem:[#allocation2 + $0x11] sm:$0xff] }
 0x1fa   : > { %v1555_v49 = vpop.f32.mrb[24].mxu0  ;;  %v1372_v50 = vpop.f32.mrb[40].mxu1 }
 0x1fb   : > { %v1556_v51 = vadd.f32 %v1555_v49, %v1340_v16  ;;  %v2299_v53 = vpop.f32.mrb[25].mxu0  ;;  %v2261_v55 = vpop.f32.mrb[41].mxu1  ;;  %v1814_v49 = vld [vmem:[%s2971_s13 + $0x8] sm:$0xff] }
 0x1fc   : > { %v1558_v1 = vpop.f32.mrb[26].mxu0  ;;  %v1375_v2 = vpop.f32.mrb[42].mxu1  ;;  %v1639_v55 = vld [vmem:[#allocation2 + $0x19] sm:$0xff] }
 0x1fd   : > { %1622 = vst.msk [vmem:[#allocation2 + $0x60] sm:$0xff] %vm295_vm5, %v1556_v51  ;;  %v1559_v22 = vadd.f32 %v1558_v1, %v1343_v6  ;;  %1710 = vrot.lane.b32.xlu0 %v1556_v51, %s2452_s14  ;;  %v2300_v57 = vpop.f32.mrb[27].mxu0  ;;  %v2262_v21 = vpop.f32.mrb[43].mxu1 }
 0x1fe   : > { %v1640_v21 = vld [vmem:[#allocation2 + $0x21] sm:$0xff] }
 0x1ff   : > { %1623 = vst.msk [vmem:[#allocation2 + $0x68] sm:$0xff] %vm295_vm5, %v1559_v22  ;;  %1712 = vrot.lane.b32.xlu1 %v1559_v22, %s2452_s14  ;;  %v1815_v22 = vld [vmem:[%s2971_s13 + $0x10] sm:$0xff] }
 0x202   : > { %v1380_v61 = vpop.f32.mrb[44].mxu1  ;;  %v1563_v62 = vpop.f32.mrb[28].mxu0 }
 0x203   : > { %v1564_v63 = vadd.f32 %v1563_v62, %v1348_v24  ;;  %v2265_v54 = vpop.f32.mrb[45].mxu1  ;;  %v2303_v40 = vpop.f32.mrb[29].mxu0  ;;  %v1946_v62 = vld [vmem:[%s3373_s4] sm:$0xff] }
 0x204   : > { %v1383_v3 = vpop.f32.mrb[46].mxu1  ;;  %v1566_v60 = vpop.f32.mrb[30].mxu0  ;;  %v1947_v54 = vld [vmem:[%s3373_s4 + $0x8] sm:$0xff] }
 0x205   : > { %1624 = vst.msk [vmem:[#allocation2 + $0x70] sm:$0xff] %vm295_vm5, %v1564_v63  ;;  %v1567_v8 = vadd.f32 %v1566_v60, %v1351_v27  ;;  %v2266_v9 = vpop.f32.mrb[47].mxu1  ;;  %1714 = vrot.lane.b32.xlu0 %v1564_v63, %s2452_s14  ;;  %v2304_v56 = vpop.f32.mrb[31].mxu0  ;;  %v1816_v60 = vld [vmem:[%s2971_s13 + $0x18] sm:$0xff] }
 0x206   : > { %v1641_v9 = vld [vmem:[#allocation2 + $0x29] sm:$0xff] }
 0x207   : > { %1625 = vst.msk [vmem:[#allocation2 + $0x78] sm:$0xff] %vm295_vm5, %v1567_v8  ;;  %1716 = vrot.lane.b32.xlu1 %v1567_v8, %s2452_s14 }
 0x20a   : > { %v1388_v59 = vpop.f32.mrb[48].mxu1  ;;  %v1571_v11 = vpop.f32.mrb[32].mxu0 }
 0x20b   : > { %v1572_v12 = vadd.f32 %v1571_v11, %v1356_v42  ;;  %v2269_v31 = vpop.f32.mrb[49].mxu1  ;;  %v2307_v16 = vpop.f32.mrb[33].mxu0 }
 0x20c   : > { %v1391_v19 = vpop.f32.mrb[50].mxu1  ;;  %v1574_v28 = vpop.f32.mrb[34].mxu0 }
 0x20d   : > { %1626 = vst.msk [vmem:[#allocation2 + $0x80] sm:$0xff] %vm295_vm5, %v1572_v12  ;;  %v1575_v4 = vadd.f32 %v1574_v28, %v1359_v15  ;;  %v2270_v58 = vpop.f32.mrb[51].mxu1  ;;  %1718 = vrot.lane.b32.xlu0 %v1572_v12, %s2452_s14  ;;  %v2308_v6 = vpop.f32.mrb[35].mxu0  ;;  %v1817_v19 = vld [vmem:[%s2971_s13 + $0x20] sm:$0xff] }
 0x20e   : > { %v1948_v6 = vld [vmem:[%s3373_s4 + $0x10] sm:$0xff] }
 0x20f   : > { %1627 = vst.msk [vmem:[#allocation2 + $0x88] sm:$0xff] %vm295_vm5, %v1575_v4  ;;  %1720 = vrot.lane.b32.xlu1 %v1575_v4, %s2452_s14  ;;  %v1642_v4 = vld [vmem:[#allocation2 + $0x31] sm:$0xff] }
 0x212   : > { %v1579_v52 = vpop.f32.mrb[36].mxu0 }
 0x213   : > { %v1580_v20 = vadd.f32 %v1579_v52, %v1364_v46  ;;  %v2311_v29 = vpop.f32.mrb[37].mxu0 }
 0x214   : > { %v1582_v0 = vpop.f32.mrb[38].mxu0 }
 0x215   : > { %1628 = vst.msk [vmem:[#allocation2 + $0x90] sm:$0xff] %vm295_vm5, %v1580_v20  ;;  %v1583_v24 = vadd.f32 %v1582_v0, %v1367_v26  ;;  %1722 = vrot.lane.b32.xlu0 %v1580_v20, %s2452_s14  ;;  %v2312_v13 = vpop.f32.mrb[39].mxu0  ;;  %v1818_v0 = vld [vmem:[%s2971_s13 + $0x28] sm:$0xff] }
 0x216   : > { %v1643_v13 = vld [vmem:[#allocation2 + $0x39] sm:$0xff] }
 0x217   : > { %1629 = vst.msk [vmem:[#allocation2 + $0x98] sm:$0xff] %vm295_vm5, %v1583_v24  ;;  %1724 = vrot.lane.b32.xlu1 %v1583_v24, %s2452_s14 }
 0x21a   : > { %v1587_v14 = vpop.f32.mrb[40].mxu0 }
 0x21b   : > { %v1588_v35 = vadd.f32 %v1587_v14, %v1372_v50  ;;  %v2315_v36 = vpop.f32.mrb[41].mxu0 }
 0x21c   : > { %v1590_v27 = vpop.f32.mrb[42].mxu0  ;;  %v1949_v36 = vld [vmem:[%s3373_s4 + $0x18] sm:$0xff] }
 0x21d   : > { %1630 = vst.msk [vmem:[#allocation2 + $0xa0] sm:$0xff] %vm295_vm5, %v1588_v35  ;;  %v1591_v33 = vadd.f32 %v1590_v27, %v1375_v2  ;;  %1726 = vrot.lane.b32.xlu0 %v1588_v35, %s2452_s14  ;;  %v2316_v37 = vpop.f32.mrb[43].mxu0 }
 0x21f   : > { %1631 = vst.msk [vmem:[#allocation2 + $0xa8] sm:$0xff] %vm295_vm5, %v1591_v33  ;;  %1728 = vrot.lane.b32.xlu1 %v1591_v33, %s2452_s14 }
 0x222   : > { %v1595_v39 = vpop.f32.mrb[44].mxu0 }
 0x223   : > { %v1596_v7 = vadd.f32 %v1595_v39, %v1380_v61  ;;  %v2319_v23 = vpop.f32.mrb[45].mxu0  ;;  %v1819_v39 = vld [vmem:[%s2971_s13 + $0x30] sm:$0xff] }
 0x224   : > { %v1598_v42 = vpop.f32.mrb[46].mxu0  ;;  %v1644_v23 = vld [vmem:[#allocation2 + $0x41] sm:$0xff] }
 0x225   : > { %1632 = vst.msk [vmem:[#allocation2 + $0xb0] sm:$0xff] %vm295_vm5, %v1596_v7  ;;  %v1599_v25 = vadd.f32 %v1598_v42, %v1383_v3  ;;  %1730 = vrot.lane.b32.xlu0 %v1596_v7, %s2452_s14  ;;  %v2320_v41 = vpop.f32.mrb[47].mxu0 }
 0x226   : > { %v1950_v41 = vld [vmem:[%s3373_s4 + $0x20] sm:$0xff] }
 0x227   : > { %1633 = vst.msk [vmem:[#allocation2 + $0xb8] sm:$0xff] %vm295_vm5, %v1599_v25  ;;  %1732 = vrot.lane.b32.xlu1 %v1599_v25, %s2452_s14 }
 0x22a   : > { %v1603_v43 = vpop.f32.mrb[48].mxu0 }
 0x22b   : > { %v1604_v44 = vadd.f32 %v1603_v43, %v1388_v59  ;;  %v2323_v15 = vpop.f32.mrb[49].mxu0 }
 0x22c   : > { %v1606_v45 = vpop.f32.mrb[50].mxu0 }
 0x22d   : > { %1634 = vst.msk [vmem:[#allocation2 + $0xc0] sm:$0xff] %vm295_vm5, %v1604_v44  ;;  %1734 = vrot.lane.b32.xlu0 %v1604_v44, %s2452_s14  ;;  %v2324_v30 = vpop.f32.mrb[51].mxu0  ;;  %v1820_v45 = vld [vmem:[%s2971_s13 + $0x38] sm:$0xff] }
 0x23f   : > { %v1687_v38 = vpop.permute.xlu1 %1686 }
 0x240   : > { %v1761_v46 = vadd.f32 %v1687_v38, %v1636_v18  ;;  %v1645_v38 = vld [vmem:[#allocation2 + $0x49] sm:$0xff] }
 0x241   : > { %v1689_v32 = vpop.permute.xlu0 %1688 }
 0x242   : > { %1786 = vst.msk [vmem:[#allocation2 + $0x1] sm:$0xff] %vm295_vm5, %v1761_v46  ;;  %v1762_v5 = vadd.f32 %v1689_v32, %v1637_v47  ;;  %v1951_v47 = vld [vmem:[%s3373_s4 + $0x28] sm:$0xff] }
 0x244   : > { %1787 = vst.msk [vmem:[#allocation2 + $0x9] sm:$0xff] %vm295_vm5, %v1762_v5 }
 0x247   : > { %v1691_v26 = vpop.permute.xlu1 %1690 }
 0x248   : > { %v1763_v17 = vadd.f32 %v1691_v26, %v1638_v48  ;;  %v1821_v26 = vld [vmem:[%s2971_s13 + $0x40] sm:$0xff]  ;;  %v1646_v48 = vld [vmem:[#allocation2 + $0x51] sm:$0xff] }
 0x249   : > { %v1839_v10 = vld [vmem:[#allocation2] sm:$0xff] }
 0x24a   : > { %v1865_v50 = vadd.f32 %v1839_v10, %v1813_v34  ;;  %1788 = vst.msk [vmem:[#allocation2 + $0x11] sm:$0xff] %vm295_vm5, %v1763_v17 }
 0x24b   : > { %v1840_v51 = vld [vmem:[#allocation2 + $0x8] sm:$0xff]  ;;  %v1693_v53 = vpop.permute.xlu1 %1692 }
 0x24c   : > { %1891 = vst.msk [vmem:[%s2971_s13] sm:$0xff] %vm295_vm5, %v1865_v50  ;;  %v1866_v1 = vadd.f32 %v1840_v51, %v1814_v49  ;;  %v1764_v2 = vadd.f32 %v1693_v53, %v1639_v55  ;;  %v1952_v50 = vld [vmem:[%s3373_s4 + $0x30] sm:$0xff]  ;;  %v1647_v55 = vld [vmem:[#allocation2 + $0x59] sm:$0xff] }
 0x24e   : > { %1892 = vst.msk [vmem:[%s2971_s13 + $0x8] sm:$0xff] %vm295_vm5, %v1866_v1  ;;  %1789 = vst.msk [vmem:[#allocation2 + $0x19] sm:$0xff] %vm295_vm5, %v1764_v2 }
 0x24f   : > { %v1695_v57 = vpop.permute.xlu1 %1694 }
 0x250   : > { %v1765_v61 = vadd.f32 %v1695_v57, %v1640_v21  ;;  %v1822_v57 = vld [vmem:[%s2971_s13 + $0x48] sm:$0xff] }
 0x251   : > { %v1841_v63 = vld [vmem:[#allocation2 + $0x10] sm:$0xff] }
 0x252   : > { %v1867_v40 = vadd.f32 %v1841_v63, %v1815_v22  ;;  %1790 = vst.msk [vmem:[#allocation2 + $0x21] sm:$0xff] %vm295_vm5, %v1765_v61  ;;  %v1953_v61 = vld [vmem:[%s3373_s4 + $0x38] sm:$0xff] }
 0x253   : > { %v1920_v3 = vld [vmem:[%s2971_s13] sm:$0xff]  ;;  %v1697_v8 = vpop.permute.xlu1 %1696 }
 0x254   : > { %v1972_v56 = vmul.f32 %v1946_v62, %v1920_v3  ;;  %1893 = vst.msk [vmem:[%s2971_s13 + $0x10] sm:$0xff] %vm295_vm5, %v1867_v40  ;;  %v1766_v59 = vadd.f32 %v1697_v8, %v1641_v9  ;;  %v1823_v40 = vld [vmem:[%s2971_s13 + $0x50] sm:$0xff]  ;;  %v1648_v3 = vld [vmem:[#allocation2 + $0x61] sm:$0xff] }
 0x255   : > { %v1921_v11 = vld [vmem:[%s2971_s13 + $0x8] sm:$0xff]  ;;  %v1842_v12 = vld [vmem:[#allocation2 + $0x18] sm:$0xff]  ;;  %v1954_v9 = vld [vmem:[%s3373_s4 + $0x40] sm:$0xff] }
 0x256   : > { %1998 = vst.msk [vmem:[%s2971_s13] sm:$0xff] %vm295_vm5, %v1972_v56  ;;  %v1973_v31 = vmul.f32 %v1947_v54, %v1921_v11  ;;  %v1868_v16 = vadd.f32 %v1842_v12, %v1816_v60  ;;  %1791 = vst.msk [vmem:[#allocation2 + $0x29] sm:$0xff] %vm295_vm5, %v1766_v59  ;;  %v1824_v11 = vld [vmem:[%s2971_s13 + $0x58] sm:$0xff] }
 0x257   : > { %v1699_v28 = vpop.permute.xlu1 %1698 }
 0x258   : > { %1999 = vst.msk [vmem:[%s2971_s13 + $0x8] sm:$0xff] %vm295_vm5, %v1973_v31  ;;  %1894 = vst.msk [vmem:[%s2971_s13 + $0x18] sm:$0xff] %vm295_vm5, %v1868_v16  ;;  %v1767_v58 = vadd.f32 %v1699_v28, %v1642_v4  ;;  %v1649_v31 = vld [vmem:[#allocation2 + $0x69] sm:$0xff] }
 0x259   : > { %v1843_v52 = vld [vmem:[#allocation2 + $0x20] sm:$0xff] }
 0x25a   : > { %v1869_v20 = vadd.f32 %v1843_v52, %v1817_v19  ;;  %1792 = vst.msk [vmem:[#allocation2 + $0x31] sm:$0xff] %vm295_vm5, %v1767_v58  ;;  %v1955_v52 = vld [vmem:[%s3373_s4 + $0x48] sm:$0xff] }
 0x25b   : > { %v1922_v29 = vld [vmem:[%s2971_s13 + $0x10] sm:$0xff]  ;;  %v1701_v24 = vpop.permute.xlu1 %1700 }
 0x25c   : > { %v1974_v14 = vmul.f32 %v1948_v6, %v1922_v29  ;;  %1895 = vst.msk [vmem:[%s2971_s13 + $0x20] sm:$0xff] %vm295_vm5, %v1869_v20  ;;  %v1768_v35 = vadd.f32 %v1701_v24, %v1643_v13  ;;  %v1825_v29 = vld [vmem:[%s2971_s13 + $0x60] sm:$0xff] }
 0x25d   : > { %v1844_v27 = vld [vmem:[#allocation2 + $0x28] sm:$0xff] }
 0x25e   : > { %2000 = vst.msk [vmem:[%s2971_s13 + $0x10] sm:$0xff] %vm295_vm5, %v1974_v14  ;;  %v1870_v33 = vadd.f32 %v1844_v27, %v1818_v0  ;;  %1793 = vst.msk [vmem:[#allocation2 + $0x39] sm:$0xff] %vm295_vm5, %v1768_v35  ;;  %v1650_v0 = vld [vmem:[#allocation2 + $0x71] sm:$0xff]  ;;  %v1826_v27 = vld [vmem:[%s2971_s13 + $0x68] sm:$0xff] }
 0x25f   : > { %v1923_v37 = vld [vmem:[%s2971_s13 + $0x18] sm:$0xff]  ;;  %v1703_v7 = vpop.permute.xlu1 %1702  ;;  %v1956_v14 = vld [vmem:[%s3373_s4 + $0x50] sm:$0xff] }
 0x260   : > { %v1975_v42 = vmul.f32 %v1949_v36, %v1923_v37  ;;  %1896 = vst.msk [vmem:[%s2971_s13 + $0x28] sm:$0xff] %vm295_vm5, %v1870_v33  ;;  %v1769_v25 = vadd.f32 %v1703_v7, %v1644_v23  ;;  %v1651_v37 = vld [vmem:[#allocation2 + $0x79] sm:$0xff] }
 0x261   : > { %v1845_v43 = vld [vmem:[#allocation2 + $0x30] sm:$0xff] }
 0x262   : > { %2001 = vst.msk [vmem:[%s2971_s13 + $0x18] sm:$0xff] %vm295_vm5, %v1975_v42  ;;  %v1871_v44 = vadd.f32 %v1845_v43, %v1819_v39  ;;  %1794 = vst.msk [vmem:[#allocation2 + $0x41] sm:$0xff] %vm295_vm5, %v1769_v25  ;;  %v1957_v42 = vld [vmem:[%s3373_s4 + $0x58] sm:$0xff] }
 0x263   : > { %v1924_v15 = vld [vmem:[%s2971_s13 + $0x20] sm:$0xff]  ;;  %v1705_v30 = vpop.permute.xlu1 %1704 }
 0x264   : > { %v1976_v18 = vmul.f32 %v1950_v41, %v1924_v15  ;;  %1897 = vst.msk [vmem:[%s2971_s13 + $0x30] sm:$0xff] %vm295_vm5, %v1871_v44  ;;  %v1770_v46 = vadd.f32 %v1705_v30, %v1645_v38  ;;  %v1652_v30 = vld [vmem:[#allocation2 + $0x81] sm:$0xff] }
 0x265   : > { %v1846_v32 = vld [vmem:[#allocation2 + $0x38] sm:$0xff] }
 0x266   : > { %2002 = vst.msk [vmem:[%s2971_s13 + $0x20] sm:$0xff] %vm295_vm5, %v1976_v18  ;;  %v1872_v5 = vadd.f32 %v1846_v32, %v1820_v45  ;;  %1795 = vst.msk [vmem:[#allocation2 + $0x49] sm:$0xff] %vm295_vm5, %v1770_v46  ;;  %v1827_v45 = vld [vmem:[%s2971_s13 + $0x70] sm:$0xff]  ;;  %v1958_v18 = vld [vmem:[%s3373_s4 + $0x60] sm:$0xff] }
 0x267   : > { %v1925_v34 = vld [vmem:[%s2971_s13 + $0x28] sm:$0xff]  ;;  %v1707_v17 = vpop.permute.xlu0 %1706  ;;  %v1828_v32 = vld [vmem:[%s2971_s13 + $0x78] sm:$0xff] }
 0x268   : > { %v1977_v10 = vmul.f32 %v1951_v47, %v1925_v34  ;;  %1898 = vst.msk [vmem:[%s2971_s13 + $0x38] sm:$0xff] %vm295_vm5, %v1872_v5  ;;  %v1771_v49 = vadd.f32 %v1707_v17, %v1646_v48  ;;  %v1653_v34 = vld [vmem:[#allocation2 + $0x89] sm:$0xff] }
 0x269   : > { %v1847_v51 = vld [vmem:[#allocation2 + $0x40] sm:$0xff]  ;;  %v1709_v53 = vpop.permute.xlu1 %1708 }
 0x26a   : > { %2003 = vst.msk [vmem:[%s2971_s13 + $0x28] sm:$0xff] %vm295_vm5, %v1977_v10  ;;  %v1873_v1 = vadd.f32 %v1847_v51, %v1821_v26  ;;  %1796 = vst.msk [vmem:[#allocation2 + $0x51] sm:$0xff] %vm295_vm5, %v1771_v49  ;;  %v1772_v2 = vadd.f32 %v1709_v53, %v1647_v55  ;;  %v1959_v10 = vld [vmem:[%s3373_s4 + $0x68] sm:$0xff] }
 0x26b   : > { %v1926_v22 = vld [vmem:[%s2971_s13 + $0x30] sm:$0xff] }
 0x26c   : > { %v1978_v21 = vmul.f32 %v1952_v50, %v1926_v22  ;;  %1899 = vst.msk [vmem:[%s2971_s13 + $0x40] sm:$0xff] %vm295_vm5, %v1873_v1  ;;  %1797 = vst.msk [vmem:[#allocation2 + $0x59] sm:$0xff] %vm295_vm5, %v1772_v2  ;;  %v1829_v1 = vld [vmem:[%s2971_s13 + $0x80] sm:$0xff]  ;;  %v1654_v2 = vld [vmem:[#allocation2 + $0x91] sm:$0xff] }
 0x26d   : > { %v1848_v62 = vld [vmem:[#allocation2 + $0x48] sm:$0xff] }
 0x26e   : > { %2004 = vst.msk [vmem:[%s2971_s13 + $0x30] sm:$0xff] %vm295_vm5, %v1978_v21  ;;  %v1874_v63 = vadd.f32 %v1848_v62, %v1822_v57  ;;  %v1960_v57 = vld [vmem:[%s3373_s4 + $0x70] sm:$0xff]  ;;  %v1830_v62 = vld [vmem:[%s2971_s13 + $0x88] sm:$0xff] }
 0x26f   : > { %v1927_v54 = vld [vmem:[%s2971_s13 + $0x38] sm:$0xff]  ;;  %v1711_v60 = vpop.permute.xlu0 %1710 }
 0x270   : > { %v1979_v8 = vmul.f32 %v1953_v61, %v1927_v54  ;;  %1900 = vst.msk [vmem:[%s2971_s13 + $0x48] sm:$0xff] %vm295_vm5, %v1874_v63  ;;  %v1773_v56 = vadd.f32 %v1711_v60, %v1648_v3  ;;  %v1655_v54 = vld [vmem:[#allocation2 + $0x99] sm:$0xff] }
 0x271   : > { %v1849_v59 = vld [vmem:[#allocation2 + $0x50] sm:$0xff]  ;;  %v1713_v12 = vpop.permute.xlu1 %1712 }
 0x272   : > { %2005 = vst.msk [vmem:[%s2971_s13 + $0x38] sm:$0xff] %vm295_vm5, %v1979_v8  ;;  %v1875_v16 = vadd.f32 %v1849_v59, %v1823_v40  ;;  %1798 = vst.msk [vmem:[#allocation2 + $0x61] sm:$0xff] %vm295_vm5, %v1773_v56  ;;  %v1774_v19 = vadd.f32 %v1713_v12, %v1649_v31  ;;  %v1961_v8 = vld [vmem:[%s3373_s4 + $0x78] sm:$0xff]  ;;  %v1831_v31 = vld [vmem:[%s2971_s13 + $0x90] sm:$0xff] }
 0x273   : > { %v1928_v28 = vld [vmem:[%s2971_s13 + $0x40] sm:$0xff]  ;;  %v1850_v4 = vld [vmem:[#allocation2 + $0x58] sm:$0xff] }
 0x274   : > { %v1980_v58 = vmul.f32 %v1954_v9, %v1928_v28  ;;  %1901 = vst.msk [vmem:[%s2971_s13 + $0x50] sm:$0xff] %vm295_vm5, %v1875_v16  ;;  %v1876_v6 = vadd.f32 %v1850_v4, %v1824_v11  ;;  %1799 = vst.msk [vmem:[#allocation2 + $0x69] sm:$0xff] %vm295_vm5, %v1774_v19  ;;  %v1656_v16 = vld [vmem:[#allocation2 + $0xa1] sm:$0xff] }
 0x275   : > { %v1962_v28 = vld [vmem:[%s3373_s4 + $0x80] sm:$0xff] }
 0x276   : > { %2006 = vst.msk [vmem:[%s2971_s13 + $0x40] sm:$0xff] %vm295_vm5, %v1980_v58  ;;  %1902 = vst.msk [vmem:[%s2971_s13 + $0x58] sm:$0xff] %vm295_vm5, %v1876_v6  ;;  %v1832_v6 = vld [vmem:[%s2971_s13 + $0x98] sm:$0xff] }
 0x277   : > { %v1929_v20 = vld [vmem:[%s2971_s13 + $0x48] sm:$0xff]  ;;  %v1715_v24 = vpop.permute.xlu0 %1714 }
 0x278   : > { %v1981_v13 = vmul.f32 %v1955_v52, %v1929_v20  ;;  %v1775_v35 = vadd.f32 %v1715_v24, %v1650_v0  ;;  %v1657_v20 = vld [vmem:[#allocation2 + $0xa9] sm:$0xff] }
 0x279   : > { %v1851_v36 = vld [vmem:[#allocation2 + $0x60] sm:$0xff]  ;;  %v1717_v33 = vpop.permute.xlu1 %1716 }
 0x27a   : > { %2007 = vst.msk [vmem:[%s2971_s13 + $0x48] sm:$0xff] %vm295_vm5, %v1981_v13  ;;  %v1877_v39 = vadd.f32 %v1851_v36, %v1825_v29  ;;  %1800 = vst.msk [vmem:[#allocation2 + $0x71] sm:$0xff] %vm295_vm5, %v1775_v35  ;;  %v1776_v7 = vadd.f32 %v1717_v33, %v1651_v37  ;;  %v1963_v13 = vld [vmem:[%s3373_s4 + $0x88] sm:$0xff]  ;;  %v1833_v37 = vld [vmem:[%s2971_s13 + $0xa0] sm:$0xff] }
 0x27b   : > { %v1930_v23 = vld [vmem:[%s2971_s13 + $0x50] sm:$0xff]  ;;  %v1852_v25 = vld [vmem:[#allocation2 + $0x68] sm:$0xff] }
 0x27c   : > { %v1982_v41 = vmul.f32 %v1956_v14, %v1930_v23  ;;  %1903 = vst.msk [vmem:[%s2971_s13 + $0x60] sm:$0xff] %vm295_vm5, %v1877_v39  ;;  %v1878_v43 = vadd.f32 %v1852_v25, %v1826_v27  ;;  %1801 = vst.msk [vmem:[#allocation2 + $0x79] sm:$0xff] %vm295_vm5, %v1776_v7  ;;  %v1658_v39 = vld [vmem:[#allocation2 + $0xb1] sm:$0xff] }
 0x27d   : > { %v1931_v44 = vld [vmem:[%s2971_s13 + $0x58] sm:$0xff]  ;;  %v1964_v23 = vld [vmem:[%s3373_s4 + $0x90] sm:$0xff] }
 0x27e   : > { %2008 = vst.msk [vmem:[%s2971_s13 + $0x50] sm:$0xff] %vm295_vm5, %v1982_v41  ;;  %v1983_v15 = vmul.f32 %v1957_v42, %v1931_v44  ;;  %1904 = vst.msk [vmem:[%s2971_s13 + $0x68] sm:$0xff] %vm295_vm5, %v1878_v43  ;;  %v1834_v41 = vld [vmem:[%s2971_s13 + $0xa8] sm:$0xff]  ;;  %v1659_v44 = vld [vmem:[#allocation2 + $0xb9] sm:$0xff] }
 0x27f   : > { %v1719_v38 = vpop.permute.xlu0 %1718 }
 0x280   : > { %2009 = vst.msk [vmem:[%s2971_s13 + $0x58] sm:$0xff] %vm295_vm5, %v1983_v15  ;;  %v1777_v46 = vadd.f32 %v1719_v38, %v1652_v30  ;;  %v1965_v38 = vld [vmem:[%s3373_s4 + $0x98] sm:$0xff] }
 0x281   : > { %v1853_v47 = vld [vmem:[#allocation2 + $0x70] sm:$0xff]  ;;  %v1721_v5 = vpop.permute.xlu1 %1720 }
 0x282   : > { %v1879_v26 = vadd.f32 %v1853_v47, %v1827_v45  ;;  %1802 = vst.msk [vmem:[#allocation2 + $0x81] sm:$0xff] %vm295_vm5, %v1777_v46  ;;  %v1778_v48 = vadd.f32 %v1721_v5, %v1653_v34  ;;  %v1835_v34 = vld [vmem:[%s2971_s13 + $0xb0] sm:$0xff] }
 0x283   : > { %v1932_v17 = vld [vmem:[%s2971_s13 + $0x60] sm:$0xff]  ;;  %v1854_v49 = vld [vmem:[#allocation2 + $0x78] sm:$0xff] }
 0x284   : > { %v1984_v50 = vmul.f32 %v1958_v18, %v1932_v17  ;;  %1905 = vst.msk [vmem:[%s2971_s13 + $0x70] sm:$0xff] %vm295_vm5, %v1879_v26  ;;  %v1880_v51 = vadd.f32 %v1854_v49, %v1828_v32  ;;  %1803 = vst.msk [vmem:[#allocation2 + $0x89] sm:$0xff] %vm295_vm5, %v1778_v48  ;;  %v1660_v26 = vld [vmem:[#allocation2 + $0xc1] sm:$0xff] }
 0x285   : > { %v1933_v53 = vld [vmem:[%s2971_s13 + $0x68] sm:$0xff] }
 0x286   : > { %2010 = vst.msk [vmem:[%s2971_s13 + $0x60] sm:$0xff] %vm295_vm5, %v1984_v50  ;;  %v1985_v55 = vmul.f32 %v1959_v10, %v1933_v53  ;;  %1906 = vst.msk [vmem:[%s2971_s13 + $0x78] sm:$0xff] %vm295_vm5, %v1880_v51  ;;  %v1966_v10 = vld [vmem:[%s3373_s4 + $0xa0] sm:$0xff]  ;;  %v1836_v50 = vld [vmem:[%s2971_s13 + $0xb8] sm:$0xff] }
 0x287   : > { %v1723_v22 = vpop.permute.xlu0 %1722 }
 0x288   : > { %2011 = vst.msk [vmem:[%s2971_s13 + $0x68] sm:$0xff] %vm295_vm5, %v1985_v55  ;;  %v1779_v21 = vadd.f32 %v1723_v22, %v1654_v2  ;;  %v1967_v55 = vld [vmem:[%s3373_s4 + $0xa8] sm:$0xff] }
 0x289   : > { %v1855_v61 = vld [vmem:[#allocation2 + $0x80] sm:$0xff]  ;;  %v1725_v63 = vpop.permute.xlu1 %1724 }
 0x28a   : > { %v1881_v40 = vadd.f32 %v1855_v61, %v1829_v1  ;;  %1804 = vst.msk [vmem:[#allocation2 + $0x91] sm:$0xff] %vm295_vm5, %v1779_v21  ;;  %v1780_v3 = vadd.f32 %v1725_v63, %v1655_v54  ;;  %v1837_v61 = vld [vmem:[%s2971_s13 + $0xc0] sm:$0xff]  ;;  %v1968_v63 = vld [vmem:[%s3373_s4 + $0xb0] sm:$0xff] }
 0x28b   : > { %v1934_v60 = vld [vmem:[%s2971_s13 + $0x70] sm:$0xff]  ;;  %v1856_v9 = vld [vmem:[#allocation2 + $0x88] sm:$0xff] }
 0x28c   : > { %v1986_v56 = vmul.f32 %v1960_v57, %v1934_v60  ;;  %1907 = vst.msk [vmem:[%s2971_s13 + $0x80] sm:$0xff] %vm295_vm5, %v1881_v40  ;;  %v1882_v59 = vadd.f32 %v1856_v9, %v1830_v62  ;;  %1805 = vst.msk [vmem:[#allocation2 + $0x99] sm:$0xff] %vm295_vm5, %v1780_v3  ;;  %v1838_v62 = vld [vmem:[%s2971_s13 + $0xc8] sm:$0xff]  ;;  %v1969_v9 = vld [vmem:[%s3373_s4 + $0xb8] sm:$0xff] }
 0x28d   : > { %v1935_v11 = vld [vmem:[%s2971_s13 + $0x78] sm:$0xff] }
 0x28e   : > { %2012 = vst.msk [vmem:[%s2971_s13 + $0x70] sm:$0xff] %vm295_vm5, %v1986_v56  ;;  %v1987_v12 = vmul.f32 %v1961_v8, %v1935_v11  ;;  %1908 = vst.msk [vmem:[%s2971_s13 + $0x88] sm:$0xff] %vm295_vm5, %v1882_v59 }
 0x28f   : > { %v1727_v19 = vpop.permute.xlu0 %1726 }
 0x290   : > { %2013 = vst.msk [vmem:[%s2971_s13 + $0x78] sm:$0xff] %vm295_vm5, %v1987_v12  ;;  %v1781_v4 = vadd.f32 %v1727_v19, %v1656_v16  ;;  %v1970_v12 = vld [vmem:[%s3373_s4 + $0xc0] sm:$0xff] }
 0x291   : > { %v1857_v58 = vld [vmem:[#allocation2 + $0x90] sm:$0xff]  ;;  %v1729_v52 = vpop.permute.xlu1 %1728 }
 0x292   : > { %v1883_v29 = vadd.f32 %v1857_v58, %v1831_v31  ;;  %1806 = vst.msk [vmem:[#allocation2 + $0xa1] sm:$0xff] %vm295_vm5, %v1781_v4  ;;  %v1782_v0 = vadd.f32 %v1729_v52, %v1657_v20  ;;  %v1971_v31 = vld [vmem:[%s3373_s4 + $0xc8] sm:$0xff] }
 0x293   : > { %v1936_v24 = vld [vmem:[%s2971_s13 + $0x80] sm:$0xff]  ;;  %v1858_v14 = vld [vmem:[#allocation2 + $0x98] sm:$0xff] }
 0x294   : > { %v1988_v35 = vmul.f32 %v1962_v28, %v1936_v24  ;;  %1909 = vst.msk [vmem:[%s2971_s13 + $0x90] sm:$0xff] %vm295_vm5, %v1883_v29  ;;  %v1884_v36 = vadd.f32 %v1858_v14, %v1832_v6  ;;  %1807 = vst.msk [vmem:[#allocation2 + $0xa9] sm:$0xff] %vm295_vm5, %v1782_v0 }
 0x295   : > { %v1937_v27 = vld [vmem:[%s2971_s13 + $0x88] sm:$0xff] }
 0x296   : > { %2014 = vst.msk [vmem:[%s2971_s13 + $0x80] sm:$0xff] %vm295_vm5, %v1988_v35  ;;  %v1989_v33 = vmul.f32 %v1963_v13, %v1937_v27  ;;  %1910 = vst.msk [vmem:[%s2971_s13 + $0x98] sm:$0xff] %vm295_vm5, %v1884_v36 }
 0x297   : > { %v1731_v7 = vpop.permute.xlu0 %1730 }
 0x298   : > { %2015 = vst.msk [vmem:[%s2971_s13 + $0x88] sm:$0xff] %vm295_vm5, %v1989_v33  ;;  %v1783_v42 = vadd.f32 %v1731_v7, %v1658_v39 }
 0x299   : > { %v1859_v25 = vld [vmem:[#allocation2 + $0xa0] sm:$0xff]  ;;  %v1733_v43 = vpop.permute.xlu1 %1732 }
 0x29a   : > { %v1885_v15 = vadd.f32 %v1859_v25, %v1833_v37  ;;  %1808 = vst.msk [vmem:[#allocation2 + $0xb1] sm:$0xff] %vm295_vm5, %v1783_v42  ;;  %v1784_v45 = vadd.f32 %v1733_v43, %v1659_v44 }
 0x29b   : > { %v1938_v30 = vld [vmem:[%s2971_s13 + $0x90] sm:$0xff]  ;;  %v1860_v18 = vld [vmem:[#allocation2 + $0xa8] sm:$0xff] }
 0x29c   : > { %v1990_v46 = vmul.f32 %v1964_v23, %v1938_v30  ;;  %1911 = vst.msk [vmem:[%s2971_s13 + $0xa0] sm:$0xff] %vm295_vm5, %v1885_v15  ;;  %v1886_v47 = vadd.f32 %v1860_v18, %v1834_v41  ;;  %1809 = vst.msk [vmem:[#allocation2 + $0xb9] sm:$0xff] %vm295_vm5, %v1784_v45 }
 0x29d   : > { %v1939_v32 = vld [vmem:[%s2971_s13 + $0x98] sm:$0xff] }
 0x29e   : > { %2016 = vst.msk [vmem:[%s2971_s13 + $0x90] sm:$0xff] %vm295_vm5, %v1990_v46  ;;  %v1991_v5 = vmul.f32 %v1965_v38, %v1939_v32  ;;  %1912 = vst.msk [vmem:[%s2971_s13 + $0xa8] sm:$0xff] %vm295_vm5, %v1886_v47 }
 0x29f   : > { %v1735_v48 = vpop.permute.xlu0 %1734 }
 0x2a0   : > { %2017 = vst.msk [vmem:[%s2971_s13 + $0x98] sm:$0xff] %vm295_vm5, %v1991_v5  ;;  %v1785_v17 = vadd.f32 %v1735_v48, %v1660_v26 }
 0x2a1   : > { %v1861_v49 = vld [vmem:[#allocation2 + $0xb0] sm:$0xff] }
 0x2a2   : > { %v1887_v51 = vadd.f32 %v1861_v49, %v1835_v34  ;;  %1810 = vst.msk [vmem:[#allocation2 + $0xc1] sm:$0xff] %vm295_vm5, %v1785_v17 }
 0x2a3   : > { %v1940_v53 = vld [vmem:[%s2971_s13 + $0xa0] sm:$0xff]  ;;  %v1862_v1 = vld [vmem:[#allocation2 + $0xb8] sm:$0xff] }
 0x2a4   : > { %v1992_v2 = vmul.f32 %v1966_v10, %v1940_v53  ;;  %1913 = vst.msk [vmem:[%s2971_s13 + $0xb0] sm:$0xff] %vm295_vm5, %v1887_v51  ;;  %v1888_v22 = vadd.f32 %v1862_v1, %v1836_v50 }
 0x2a5   : > { %v1941_v57 = vld [vmem:[%s2971_s13 + $0xa8] sm:$0xff] }
 0x2a6   : > { %2018 = vst.msk [vmem:[%s2971_s13 + $0xa0] sm:$0xff] %vm295_vm5, %v1992_v2  ;;  %v1993_v21 = vmul.f32 %v1967_v55, %v1941_v57  ;;  %1914 = vst.msk [vmem:[%s2971_s13 + $0xb8] sm:$0xff] %vm295_vm5, %v1888_v22 }
 0x2a8   : > { %2019 = vst.msk [vmem:[%s2971_s13 + $0xa8] sm:$0xff] %vm295_vm5, %v1993_v21 }
 0x2a9   : > { %v1863_v54 = vld [vmem:[#allocation2 + $0xc0] sm:$0xff]  ;;  %v1864_v40 = vld [vmem:[#allocation2 + $0xc8] sm:$0xff] }
 0x2aa   : > { %v1889_v3 = vadd.f32 %v1863_v54, %v1837_v61  ;;  %v1890_v60 = vadd.f32 %v1864_v40, %v1838_v62 }
 0x2ab   : > { %v1942_v8 = vld [vmem:[%s2971_s13 + $0xb0] sm:$0xff] }
 0x2ac   : > { %v1994_v56 = vmul.f32 %v1968_v63, %v1942_v8  ;;  %1915 = vst.msk [vmem:[%s2971_s13 + $0xc0] sm:$0xff] %vm295_vm5, %v1889_v3  ;;  %1916 = vst.msk [vmem:[%s2971_s13 + $0xc8] sm:$0xff] %vm295_vm5, %v1890_v60 }
 0x2ad   : > { %v1943_v59 = vld [vmem:[%s2971_s13 + $0xb8] sm:$0xff] }
 0x2ae   : > { %2020 = vst.msk [vmem:[%s2971_s13 + $0xb0] sm:$0xff] %vm295_vm5, %v1994_v56  ;;  %v1995_v11 = vmul.f32 %v1969_v9, %v1943_v59 }
 0x2b0   : > { %2021 = vst.msk [vmem:[%s2971_s13 + $0xb8] sm:$0xff] %vm295_vm5, %v1995_v11 }
 0x2b3   : > { %v1944_v16 = vld [vmem:[%s2971_s13 + $0xc0] sm:$0xff]  ;;  %v1945_v19 = vld [vmem:[%s2971_s13 + $0xc8] sm:$0xff] }
 0x2b4   : > { %v1996_v28 = vmul.f32 %v1970_v12, %v1944_v16  ;;  %v1997_v4 = vmul.f32 %v1971_v31, %v1945_v19 }
 0x2b6   : > { %2022 = vst.msk [vmem:[%s2971_s13 + $0xc0] sm:$0xff] %vm295_vm5, %v1996_v28  ;;  %2023 = vst.msk [vmem:[%s2971_s13 + $0xc8] sm:$0xff] %vm295_vm5, %v1997_v4 }
 0x2b7 PF: > { %s15_s20 = sadd.s32 1, %s2441_s20   ;;  %s3381_s18 = smov %s2437_s19 }
 0x2b8   : > { %p12_p6 = scmp.ge.s32.totalorder %s15_s20, 4   ;;  %s3382_s19 = smov %s3384_s21 }
 0x2ba   :  { %14 = sbr.rel (!%p12_p6) target bundleno = 2 (0x2), region = 82 }

</bundles_post_ra>
